<compile_context>
chip_gen: v6e
topology: v6e:2x2x1
jax: 0.10.0
libtpu: 0.0.40
codegen_flags: <defaults>
</compile_context>

<pallas_src>
import jax
import jax.numpy as jnp
from jax.experimental import pallas as pl
from jax.experimental.pallas import tpu as pltpu

HP = 128  # per-gate lane padding (one full vreg lane width)


# ---------------------------------------------------------------------------
# Fused kernel: num_layers LSTM layers + FC, everything resident in VMEM.
# ---------------------------------------------------------------------------
def _make_fused_kernel(num_layers, hidden_dim):
    H = hidden_dim

    def kernel(*refs):
        x_ref = refs[0]
        layer_refs = refs[1:1 + 3 * num_layers]
        fcw_ref = refs[1 + 3 * num_layers]
        fcb_ref = refs[2 + 3 * num_layers]
        out_ref = refs[3 + 3 * num_layers]
        seq_scr = refs[4 + 3 * num_layers]      # (T, HP)    hidden-state sequence
        gates_scr = refs[5 + 3 * num_layers]    # (T, 4*HP)  hoisted x-projection

        T = seq_scr.shape[0]
        G = 4 * HP

        # Per-lane activation constants, hoisted out of all loops.
        # Gate layout [i | f | o | g], each padded to HP lanes:
        #   sigmoid lanes (< 3*HP): act = 0.5*tanh(0.5*x) + 0.5 == sigmoid(x)
        #   candidate lanes       : act = tanh(x)
        # -> one fused tanh + affine covers all four gates exactly.
        lane = jax.lax.broadcasted_iota(jnp.int32, (1, G), 1)
        m = jnp.where(lane < 3 * HP, 0.5, 1.0).astype(jnp.float32)
        a = jnp.where(lane < 3 * HP, 0.5, 0.0).astype(jnp.float32)

        def recurrence(whh_ref):
            # Loop-invariant hoist: compact recurrent weights (H, 4*HP) bf16
            # (8 vregs), reused by every unrolled step.
            whh = whh_ref[...]
            h = jnp.zeros((1, HP), jnp.float32)
            c = jnp.zeros((1, HP), jnp.float32)
            # T is small & static -> full unroll; h/c live in vregs, only one
            # (1, HP) store per step hits VMEM on the serial path.
            for t in range(T):
                # x @ W_ih + b was precomputed for the whole sequence; only
                # the bf16 h @ W_hh matmul is per-step (f32 accumulate).
                # TODO(synk): verify via pl.lower_as_mlir that the offset-0
                # h[:, :H] slice does not emit a per-step relayout.
                pre = gates_scr[pl.ds(t, 1), :] + jnp.dot(
                    h[:, :H].astype(jnp.bfloat16), whh,
                    preferred_element_type=jnp.float32)        # (1, 4*HP) f32
                act = m * jnp.tanh(m * pre) + a   # [sig_i | sig_f | sig_o | tanh_g]
                # every slice below is a whole-vreg select (offsets are
                # multiples of 128): no cross-lane movement.
                i_g = act[:, 0 * HP:1 * HP]
                f_g = act[:, 1 * HP:2 * HP]
                o_g = act[:, 2 * HP:3 * HP]
                g_g = act[:, 3 * HP:4 * HP]
                c = f_g * c + i_g * g_g
                h = o_g * jnp.tanh(c)
                seq_scr[pl.ds(t, 1), :] = h
            # Padded lanes (H..HP) of h and c stay exactly 0: their gate
            # pre-activations are 0 (zero-padded weights/bias), so
            # g_pad = tanh(0) = 0, c_pad = f*0 + i*0 = 0, h_pad = o*tanh(0) = 0.

        for layer in range(num_layers):
            wih_ref = layer_refs[3 * layer + 0]
            whh_ref = layer_refs[3 * layer + 1]
            b_ref = layer_refs[3 * layer + 2]
            src = x_ref[...] if layer == 0 else seq_scr[...]
            # Hoisted input projection: one (T, D_in) @ (D_in, 4*HP) bf16 MXU
            # matmul for the whole sequence, off the serial critical path.
            gates_scr[...] = (
                jnp.dot(src.astype(jnp.bfloat16), wih_ref[...],
                        preferred_element_type=jnp.float32)
                + b_ref[...]
            )
            recurrence(whh_ref)
            # next layer consumes the hidden sequence straight from VMEM

        # FC head over the whole sequence; only this tiny (T, O) tile hits HBM.
        out_ref[...] = (
            jnp.dot(seq_scr[...].astype(jnp.bfloat16), fcw_ref[...],
                    preferred_element_type=jnp.float32)
            + fcb_ref[...]
        ).astype(out_ref.dtype)

    return kernel


def rnn_forward_fused(x, packed_layers, fc_w_p, fc_b_p, hidden_dim):
    """x: (T, D) f32.  packed_layers: list of dicts with lane-aligned packed
    weights (bf16) and bias (f32).  fc_w_p: (HP, O) bf16, fc_b_p: (1, O) f32.
    Returns (T, O) float32."""
    T, _ = x.shape
    O = fc_w_p.shape[1]
    num_layers = len(packed_layers)

    kernel = _make_fused_kernel(num_layers, hidden_dim)

    in_specs = [pl.BlockSpec(x.shape, lambda i: (0, 0))]
    operands = [x]
    for p in packed_layers:
        for name in ("w_ih", "w_hh", "b"):
            arr = p[name]
            in_specs.append(pl.BlockSpec(arr.shape, lambda i: (0, 0)))
            operands.append(arr)
    in_specs += [pl.BlockSpec(fc_w_p.shape, lambda i: (0, 0)),
                 pl.BlockSpec(fc_b_p.shape, lambda i: (0, 0))]
    operands += [fc_w_p, fc_b_p]

    return pl.pallas_call(
        kernel,
        out_shape=jax.ShapeDtypeStruct((T, O), jnp.float32),
        grid=(1,),
        in_specs=in_specs,
        out_specs=pl.BlockSpec((T, O), lambda i: (0, 0)),
        scratch_shapes=[
            pltpu.VMEM((T, HP), jnp.float32),       # hidden-state sequence
            pltpu.VMEM((T, 4 * HP), jnp.float32),   # hoisted gate pre-activations
        ],
        compiler_params=pltpu.CompilerParams(
            dimension_semantics=("arbitrary",)),
    )(*operands)


# ---------------------------------------------------------------------------
# Host-side packing: torch layout -> lane-aligned [i|f|o|g] padded layout,
# matmul operands in bf16 (MXU native), biases in f32 (added post-accumulate).
# ---------------------------------------------------------------------------
def _pack_gate_cols(w_t, H):
    """(rows, 4H) in torch gate order [i|f|g|o] -> (rows, 4*HP) in [i|f|o|g]
    order (sigmoid gates first, tanh gate last), each gate zero-padded from
    H to HP lanes so every gate slice in the kernel is vreg-aligned."""
    i_w = w_t[:, 0 * H:1 * H]
    f_w = w_t[:, 1 * H:2 * H]
    g_w = w_t[:, 2 * H:3 * H]
    o_w = w_t[:, 3 * H:4 * H]
    pad = lambda mat: jnp.pad(mat, ((0, 0), (0, HP - H)))
    return jnp.concatenate([pad(i_w), pad(f_w), pad(o_w), pad(g_w)], axis=1)


def _pad_rows(mat, rows):
    return jnp.pad(mat, ((0, rows - mat.shape[0]), (0, 0)))


def pack_params(raw_layers, fc_w, fc_b, hidden_dim):
    H = hidden_dim
    packed = []
    for layer_idx, (w_ih, w_hh, b_ih, b_hh) in enumerate(raw_layers):
        w_ih_p = _pack_gate_cols(w_ih.T, H)                  # (D_in, 4*HP)
        if layer_idx > 0:
            # layer input is the HP-padded hidden sequence -> zero-pad rows
            w_ih_p = _pad_rows(w_ih_p, HP)                   # (HP, 4*HP)
        w_hh_p = _pack_gate_cols(w_hh.T, H)                  # (H, 4*HP) compact
        b_p = _pack_gate_cols((b_ih + b_hh)[None, :], H)     # (1, 4*HP) f32
        packed.append(dict(w_ih=w_ih_p.astype(jnp.bfloat16),
                           w_hh=w_hh_p.astype(jnp.bfloat16),
                           b=b_p))
    fc_w_p = _pad_rows(fc_w.T, HP).astype(jnp.bfloat16)      # (HP, O) bf16
    fc_b_p = fc_b[None, :]                                   # (1, O) f32
    return packed, fc_w_p, fc_b_p


# ---------------------------------------------------------------------------
# Parameter init (mirrors the module's __init__):
#   LSTM weights: xavier_uniform ; LSTM biases: uniform(0, 1)
#   fc weight: xavier_uniform ; fc bias: default nn.Linear init
# ---------------------------------------------------------------------------
def xavier_uniform(key, shape):
    fan_out, fan_in = shape
    a = (6.0 / (fan_in + fan_out)) ** 0.5
    return jax.random.uniform(key, shape, jnp.float32, -a, a)


def init_params(key, input_dim, hidden_dim, num_layers, output_dim):
    raw = []
    for layer in range(num_layers):
        d_in = input_dim if layer == 0 else hidden_dim
        key, k1, k2, k3, k4 = jax.random.split(key, 5)
        w_ih = xavier_uniform(k1, (4 * hidden_dim, d_in))        # torch layout
        w_hh = xavier_uniform(k2, (4 * hidden_dim, hidden_dim))  # torch layout
        b_ih = jax.random.uniform(k3, (4 * hidden_dim,), jnp.float32, 0.0, 1.0)
        b_hh = jax.random.uniform(k4, (4 * hidden_dim,), jnp.float32, 0.0, 1.0)
        raw.append((w_ih, w_hh, b_ih, b_hh))
    key, k5, k6 = jax.random.split(key, 3)
    fc_w = xavier_uniform(k5, (output_dim, hidden_dim))          # torch layout
    bound = 1.0 / (hidden_dim ** 0.5)
    fc_b = jax.random.uniform(k6, (output_dim,), jnp.float32, -bound, bound)
    return raw, fc_w, fc_b


# ---------------------------------------------------------------------------
# Pure-JAX reference (exact nn.LSTM math).  matmul_dtype lets the reference
# mirror the kernel's bf16 MXU operands (accumulation / elementwise stay f32).
# ---------------------------------------------------------------------------
def reference_forward(x, raw_layers, fc_w, fc_b, matmul_dtype=jnp.float32):
    H = raw_layers[0][1].shape[1]

    def mm(lhs, rhs):
        return jnp.dot(lhs.astype(matmul_dtype), rhs.astype(matmul_dtype),
                       preferred_element_type=jnp.float32)

    seq = x
    for (w_ih, w_hh, b_ih, b_hh) in raw_layers:
        h = jnp.zeros((H,), jnp.float32)
        c = jnp.zeros((H,), jnp.float32)
        outs = []
        for t in range(seq.shape[0]):
            g = mm(seq[t], w_ih.T) + b_ih + mm(h, w_hh.T) + b_hh
            i = jax.nn.sigmoid(g[0 * H:1 * H])
            f = jax.nn.sigmoid(g[1 * H:2 * H])
            gg = jnp.tanh(g[2 * H:3 * H])
            o = jax.nn.sigmoid(g[3 * H:4 * H])
            c = f * c + i * gg
            h = o * jnp.tanh(c)
            outs.append(h)
        seq = jnp.stack(outs)
    return mm(seq, fc_w.T) + fc_b[None, :]


if __name__ == "__main__":
    SEQ, INPUT_DIM, HIDDEN_DIM, NUM_LAYERS, OUTPUT_DIM = 8, 16, 32, 2, 8

    key = jax.random.PRNGKey(0)
    key, kx = jax.random.split(key)
    x = jax.random.normal(kx, (SEQ, INPUT_DIM), jnp.float32)

    raw_layers, fc_w, fc_b = init_params(
        key, INPUT_DIM, HIDDEN_DIM, NUM_LAYERS, OUTPUT_DIM)
    packed_layers, fc_w_p, fc_b_p = pack_params(
        raw_layers, fc_w, fc_b, HIDDEN_DIM)

    out = rnn_forward_fused(x, packed_layers, fc_w_p, fc_b_p, HIDDEN_DIM)
    out = jax.block_until_ready(out)
    assert out.shape == (SEQ, OUTPUT_DIM) and out.dtype == jnp.float32

    # Tight check vs a reference matching the kernel's intended numerics
    # (bf16 MXU operands, f32 accumulate + f32 gate math): catches any
    # gate-packing / recurrence / activation bug.
    ref_bf16 = reference_forward(x, raw_layers, fc_w, fc_b,
                                 matmul_dtype=jnp.bfloat16)
    err_tight = float(jnp.max(jnp.abs(out - ref_bf16)))
    assert err_tight < 5e-3, f"kernel vs bf16-matched reference: {err_tight}"

    # Loose check vs exact f32 math: bounds the (intentional) quantization
    # error from feeding the MXU bf16 operands.
    ref_f32 = reference_forward(x, raw_layers, fc_w, fc_b)
    err_loose = float(jnp.max(jnp.abs(out - ref_f32)))
    assert err_loose < 1e-1, f"kernel vs exact-f32 reference: {err_loose}"

    print("KERNEL_OK")
</pallas_src>

<mosaic_0001>
module attributes {stable_mosaic.version = 11 : i64} {
  func.func @kernel(%arg0: i32, %arg1: memref<8x16xf32, #tpu.memory_space<vmem>>, %arg2: memref<16x512xbf16, #tpu.memory_space<vmem>>, %arg3: memref<32x512xbf16, #tpu.memory_space<vmem>>, %arg4: memref<1x512xf32, #tpu.memory_space<vmem>>, %arg5: memref<128x512xbf16, #tpu.memory_space<vmem>>, %arg6: memref<32x512xbf16, #tpu.memory_space<vmem>>, %arg7: memref<1x512xf32, #tpu.memory_space<vmem>>, %arg8: memref<128x8xbf16, #tpu.memory_space<vmem>>, %arg9: memref<1x8xf32, #tpu.memory_space<vmem>>, %arg10: memref<8x8xf32, #tpu.memory_space<vmem>>, %arg11: memref<8x128xf32, #tpu.memory_space<vmem>>, %arg12: memref<8x512xf32, #tpu.memory_space<vmem>>) attributes {dimension_semantics = [#tpu.dimension_semantics<arbitrary>], iteration_bounds = array<i64: 1>, scalar_prefetch = 0 : i64, scratch_operands = 2 : i64, tpu.core_type = #tpu.core_type<tc>, window_params = [{pipeline_mode = #tpu.pipeline_mode<synchronous>, transform_indices = @transform_0, window_bounds = array<i64: 8, 16>}, {pipeline_mode = #tpu.pipeline_mode<synchronous>, transform_indices = @transform_1, window_bounds = array<i64: 16, 512>}, {pipeline_mode = #tpu.pipeline_mode<synchronous>, transform_indices = @transform_2, window_bounds = array<i64: 32, 512>}, {pipeline_mode = #tpu.pipeline_mode<synchronous>, transform_indices = @transform_3, window_bounds = array<i64: 1, 512>}, {pipeline_mode = #tpu.pipeline_mode<synchronous>, transform_indices = @transform_4, window_bounds = array<i64: 128, 512>}, {pipeline_mode = #tpu.pipeline_mode<synchronous>, transform_indices = @transform_5, window_bounds = array<i64: 32, 512>}, {pipeline_mode = #tpu.pipeline_mode<synchronous>, transform_indices = @transform_6, window_bounds = array<i64: 1, 512>}, {pipeline_mode = #tpu.pipeline_mode<synchronous>, transform_indices = @transform_7, window_bounds = array<i64: 128, 8>}, {pipeline_mode = #tpu.pipeline_mode<synchronous>, transform_indices = @transform_8, window_bounds = array<i64: 1, 8>}, {pipeline_mode = #tpu.pipeline_mode<synchronous>, transform_indices = @transform_9, window_bounds = array<i64: 8, 8>}]} {
    %0 = tpu.iota {dimensions = array<i32: 1>} : vector<1x512xi32>
    %c384_i32 = arith.constant 384 : i32
    %1 = vector.broadcast %c384_i32 : i32 to vector<1x512xi32>
    %2 = arith.cmpi slt, %0, %1 : vector<1x512xi32>
    %cst = arith.constant 5.000000e-01 : f32
    %cst_0 = arith.constant 1.000000e+00 : f32
    %3 = vector.broadcast %cst : f32 to vector<1x512xf32>
    %4 = vector.broadcast %cst_0 : f32 to vector<1x512xf32>
    %5 = arith.select %2, %3, %4 : vector<1x512xi1>, vector<1x512xf32>
    %c384_i32_1 = arith.constant 384 : i32
    %6 = vector.broadcast %c384_i32_1 : i32 to vector<1x512xi32>
    %7 = arith.cmpi slt, %0, %6 : vector<1x512xi32>
    %cst_2 = arith.constant 5.000000e-01 : f32
    %cst_3 = arith.constant 0.000000e+00 : f32
    %8 = vector.broadcast %cst_2 : f32 to vector<1x512xf32>
    %9 = vector.broadcast %cst_3 : f32 to vector<1x512xf32>
    %10 = arith.select %7, %8, %9 : vector<1x512xi1>, vector<1x512xf32>
    %c0 = arith.constant 0 : index
    %c0_4 = arith.constant 0 : index
    %11 = vector.load %arg1[%c0, %c0_4] : memref<8x16xf32, #tpu.memory_space<vmem>>, vector<8x16xf32>
    %12 = arith.truncf %11 : vector<8x16xf32> to vector<8x16xbf16>
    %c0_5 = arith.constant 0 : index
    %c0_6 = arith.constant 0 : index
    %13 = vector.load %arg2[%c0_5, %c0_6] : memref<16x512xbf16, #tpu.memory_space<vmem>>, vector<16x512xbf16>
    %cst_7 = arith.constant dense<0.000000e+00> : vector<8x512xf32>
    %14 = tpu.matmul %12, %13, %cst_7 {dimension_numbers = #tpu.dot_dimension_numbers<[1], [0], [0], [1], [0, 0, 1, 1], [], []>} : vector<8x16xbf16>, vector<16x512xbf16>, vector<8x512xf32> -> vector<8x512xf32>
    %c0_8 = arith.constant 0 : index
    %c0_9 = arith.constant 0 : index
    %15 = vector.load %arg4[%c0_8, %c0_9] : memref<1x512xf32, #tpu.memory_space<vmem>>, vector<1x512xf32>
    %16 = vector.broadcast %15 : vector<1x512xf32> to vector<8x512xf32>
    %17 = arith.addf %14, %16 : vector<8x512xf32>
    %c0_10 = arith.constant 0 : index
    %c0_11 = arith.constant 0 : index
    %18 = vector.load %arg12[%c0_10, %c0_11] : memref<8x512xf32, #tpu.memory_space<vmem>>, vector<8x512xf32>
    tpu.vector_store %arg12[%c0_10, %c0_11], %17 {strides = array<i32>} : memref<8x512xf32, #tpu.memory_space<vmem>>, vector<8x512xf32>,
    %c0_12 = arith.constant 0 : index
    %c0_13 = arith.constant 0 : index
    %19 = vector.load %arg3[%c0_12, %c0_13] : memref<32x512xbf16, #tpu.memory_space<vmem>>, vector<32x512xbf16>
    %cst_14 = arith.constant 0.000000e+00 : f32
    %20 = vector.broadcast %cst_14 : f32 to vector<1x128xf32>
    %cst_15 = arith.constant 0.000000e+00 : f32
    %21 = vector.broadcast %cst_15 : f32 to vector<1x128xf32>
    %c0_16 = arith.constant 0 : index
    %c0_17 = arith.constant 0 : index
    %22 = vector.load %arg12[%c0_16, %c0_17] : memref<8x512xf32, #tpu.memory_space<vmem>>, vector<1x512xf32>
    %23 = vector.extract_strided_slice %20 {offsets = [0, 0], sizes = [1, 32], strides = [1, 1]} : vector<1x128xf32> to vector<1x32xf32>
    %24 = arith.truncf %23 : vector<1x32xf32> to vector<1x32xbf16>
    %cst_18 = arith.constant dense<0.000000e+00> : vector<1x512xf32>
    %25 = tpu.matmul %24, %19, %cst_18 {dimension_numbers = #tpu.dot_dimension_numbers<[1], [0], [0], [1], [0, 0, 1, 1], [], []>} : vector<1x32xbf16>, vector<32x512xbf16>, vector<1x512xf32> -> vector<1x512xf32>
    %26 = arith.addf %22, %25 : vector<1x512xf32>
    %27 = arith.mulf %5, %26 : vector<1x512xf32>
    %28 = math.tanh %27 : vector<1x512xf32>
    %29 = arith.mulf %5, %28 : vector<1x512xf32>
    %30 = arith.addf %29, %10 : vector<1x512xf32>
    %31 = vector.extract_strided_slice %30 {offsets = [0, 0], sizes = [1, 128], strides = [1, 1]} : vector<1x512xf32> to vector<1x128xf32>
    %32 = vector.extract_strided_slice %30 {offsets = [0, 128], sizes = [1, 128], strides = [1, 1]} : vector<1x512xf32> to vector<1x128xf32>
    %33 = vector.extract_strided_slice %30 {offsets = [0, 256], sizes = [1, 128], strides = [1, 1]} : vector<1x512xf32> to vector<1x128xf32>
    %34 = vector.extract_strided_slice %30 {offsets = [0, 384], sizes = [1, 128], strides = [1, 1]} : vector<1x512xf32> to vector<1x128xf32>
    %35 = arith.mulf %32, %21 : vector<1x128xf32>
    %36 = arith.mulf %31, %34 : vector<1x128xf32>
    %37 = arith.addf %35, %36 : vector<1x128xf32>
    %38 = math.tanh %37 : vector<1x128xf32>
    %39 = arith.mulf %33, %38 : vector<1x128xf32>
    %c0_19 = arith.constant 0 : index
    %c0_20 = arith.constant 0 : index
    %40 = vector.load %arg11[%c0_19, %c0_20] : memref<8x128xf32, #tpu.memory_space<vmem>>, vector<1x128xf32>
    tpu.vector_store %arg11[%c0_19, %c0_20], %39 {strides = array<i32>} : memref<8x128xf32, #tpu.memory_space<vmem>>, vector<1x128xf32>,
    %c1 = arith.constant 1 : index
    %c0_21 = arith.constant 0 : index
    %41 = vector.load %arg12[%c1, %c0_21] : memref<8x512xf32, #tpu.memory_space<vmem>>, vector<1x512xf32>
    %42 = vector.extract_strided_slice %39 {offsets = [0, 0], sizes = [1, 32], strides = [1, 1]} : vector<1x128xf32> to vector<1x32xf32>
    %43 = arith.truncf %42 : vector<1x32xf32> to vector<1x32xbf16>
    %cst_22 = arith.constant dense<0.000000e+00> : vector<1x512xf32>
    %44 = tpu.matmul %43, %19, %cst_22 {dimension_numbers = #tpu.dot_dimension_numbers<[1], [0], [0], [1], [0, 0, 1, 1], [], []>} : vector<1x32xbf16>, vector<32x512xbf16>, vector<1x512xf32> -> vector<1x512xf32>
    %45 = arith.addf %41, %44 : vector<1x512xf32>
    %46 = arith.mulf %5, %45 : vector<1x512xf32>
    %47 = math.tanh %46 : vector<1x512xf32>
    %48 = arith.mulf %5, %47 : vector<1x512xf32>
    %49 = arith.addf %48, %10 : vector<1x512xf32>
    %50 = vector.extract_strided_slice %49 {offsets = [0, 0], sizes = [1, 128], strides = [1, 1]} : vector<1x512xf32> to vector<1x128xf32>
    %51 = vector.extract_strided_slice %49 {offsets = [0, 128], sizes = [1, 128], strides = [1, 1]} : vector<1x512xf32> to vector<1x128xf32>
    %52 = vector.extract_strided_slice %49 {offsets = [0, 256], sizes = [1, 128], strides = [1, 1]} : vector<1x512xf32> to vector<1x128xf32>
    %53 = vector.extract_strided_slice %49 {offsets = [0, 384], sizes = [1, 128], strides = [1, 1]} : vector<1x512xf32> to vector<1x128xf32>
    %54 = arith.mulf %51, %37 : vector<1x128xf32>
    %55 = arith.mulf %50, %53 : vector<1x128xf32>
    %56 = arith.addf %54, %55 : vector<1x128xf32>
    %57 = math.tanh %56 : vector<1x128xf32>
    %58 = arith.mulf %52, %57 : vector<1x128xf32>
    %c1_23 = arith.constant 1 : index
    %c0_24 = arith.constant 0 : index
    %59 = vector.load %arg11[%c1_23, %c0_24] : memref<8x128xf32, #tpu.memory_space<vmem>>, vector<1x128xf32>
    tpu.vector_store %arg11[%c1_23, %c0_24], %58 {strides = array<i32>} : memref<8x128xf32, #tpu.memory_space<vmem>>, vector<1x128xf32>,
    %c2 = arith.constant 2 : index
    %c0_25 = arith.constant 0 : index
    %60 = vector.load %arg12[%c2, %c0_25] : memref<8x512xf32, #tpu.memory_space<vmem>>, vector<1x512xf32>
    %61 = vector.extract_strided_slice %58 {offsets = [0, 0], sizes = [1, 32], strides = [1, 1]} : vector<1x128xf32> to vector<1x32xf32>
    %62 = arith.truncf %61 : vector<1x32xf32> to vector<1x32xbf16>
    %cst_26 = arith.constant dense<0.000000e+00> : vector<1x512xf32>
    %63 = tpu.matmul %62, %19, %cst_26 {dimension_numbers = #tpu.dot_dimension_numbers<[1], [0], [0], [1], [0, 0, 1, 1], [], []>} : vector<1x32xbf16>, vector<32x512xbf16>, vector<1x512xf32> -> vector<1x512xf32>
    %64 = arith.addf %60, %63 : vector<1x512xf32>
    %65 = arith.mulf %5, %64 : vector<1x512xf32>
    %66 = math.tanh %65 : vector<1x512xf32>
    %67 = arith.mulf %5, %66 : vector<1x512xf32>
    %68 = arith.addf %67, %10 : vector<1x512xf32>
    %69 = vector.extract_strided_slice %68 {offsets = [0, 0], sizes = [1, 128], strides = [1, 1]} : vector<1x512xf32> to vector<1x128xf32>
    %70 = vector.extract_strided_slice %68 {offsets = [0, 128], sizes = [1, 128], strides = [1, 1]} : vector<1x512xf32> to vector<1x128xf32>
    %71 = vector.extract_strided_slice %68 {offsets = [0, 256], sizes = [1, 128], strides = [1, 1]} : vector<1x512xf32> to vector<1x128xf32>
    %72 = vector.extract_strided_slice %68 {offsets = [0, 384], sizes = [1, 128], strides = [1, 1]} : vector<1x512xf32> to vector<1x128xf32>
    %73 = arith.mulf %70, %56 : vector<1x128xf32>
    %74 = arith.mulf %69, %72 : vector<1x128xf32>
    %75 = arith.addf %73, %74 : vector<1x128xf32>
    %76 = math.tanh %75 : vector<1x128xf32>
    %77 = arith.mulf %71, %76 : vector<1x128xf32>
    %c2_27 = arith.constant 2 : index
    %c0_28 = arith.constant 0 : index
    %78 = vector.load %arg11[%c2_27, %c0_28] : memref<8x128xf32, #tpu.memory_space<vmem>>, vector<1x128xf32>
    tpu.vector_store %arg11[%c2_27, %c0_28], %77 {strides = array<i32>} : memref<8x128xf32, #tpu.memory_space<vmem>>, vector<1x128xf32>,
    %c3 = arith.constant 3 : index
    %c0_29 = arith.constant 0 : index
    %79 = vector.load %arg12[%c3, %c0_29] : memref<8x512xf32, #tpu.memory_space<vmem>>, vector<1x512xf32>
    %80 = vector.extract_strided_slice %77 {offsets = [0, 0], sizes = [1, 32], strides = [1, 1]} : vector<1x128xf32> to vector<1x32xf32>
    %81 = arith.truncf %80 : vector<1x32xf32> to vector<1x32xbf16>
    %cst_30 = arith.constant dense<0.000000e+00> : vector<1x512xf32>
    %82 = tpu.matmul %81, %19, %cst_30 {dimension_numbers = #tpu.dot_dimension_numbers<[1], [0], [0], [1], [0, 0, 1, 1], [], []>} : vector<1x32xbf16>, vector<32x512xbf16>, vector<1x512xf32> -> vector<1x512xf32>
    %83 = arith.addf %79, %82 : vector<1x512xf32>
    %84 = arith.mulf %5, %83 : vector<1x512xf32>
    %85 = math.tanh %84 : vector<1x512xf32>
    %86 = arith.mulf %5, %85 : vector<1x512xf32>
    %87 = arith.addf %86, %10 : vector<1x512xf32>
    %88 = vector.extract_strided_slice %87 {offsets = [0, 0], sizes = [1, 128], strides = [1, 1]} : vector<1x512xf32> to vector<1x128xf32>
    %89 = vector.extract_strided_slice %87 {offsets = [0, 128], sizes = [1, 128], strides = [1, 1]} : vector<1x512xf32> to vector<1x128xf32>
    %90 = vector.extract_strided_slice %87 {offsets = [0, 256], sizes = [1, 128], strides = [1, 1]} : vector<1x512xf32> to vector<1x128xf32>
    %91 = vector.extract_strided_slice %87 {offsets = [0, 384], sizes = [1, 128], strides = [1, 1]} : vector<1x512xf32> to vector<1x128xf32>
    %92 = arith.mulf %89, %75 : vector<1x128xf32>
    %93 = arith.mulf %88, %91 : vector<1x128xf32>
    %94 = arith.addf %92, %93 : vector<1x128xf32>
    %95 = math.tanh %94 : vector<1x128xf32>
    %96 = arith.mulf %90, %95 : vector<1x128xf32>
    %c3_31 = arith.constant 3 : index
    %c0_32 = arith.constant 0 : index
    %97 = vector.load %arg11[%c3_31, %c0_32] : memref<8x128xf32, #tpu.memory_space<vmem>>, vector<1x128xf32>
    tpu.vector_store %arg11[%c3_31, %c0_32], %96 {strides = array<i32>} : memref<8x128xf32, #tpu.memory_space<vmem>>, vector<1x128xf32>,
    %c4 = arith.constant 4 : index
    %c0_33 = arith.constant 0 : index
    %98 = vector.load %arg12[%c4, %c0_33] : memref<8x512xf32, #tpu.memory_space<vmem>>, vector<1x512xf32>
    %99 = vector.extract_strided_slice %96 {offsets = [0, 0], sizes = [1, 32], strides = [1, 1]} : vector<1x128xf32> to vector<1x32xf32>
    %100 = arith.truncf %99 : vector<1x32xf32> to vector<1x32xbf16>
    %cst_34 = arith.constant dense<0.000000e+00> : vector<1x512xf32>
    %101 = tpu.matmul %100, %19, %cst_34 {dimension_numbers = #tpu.dot_dimension_numbers<[1], [0], [0], [1], [0, 0, 1, 1], [], []>} : vector<1x32xbf16>, vector<32x512xbf16>, vector<1x512xf32> -> vector<1x512xf32>
    %102 = arith.addf %98, %101 : vector<1x512xf32>
    %103 = arith.mulf %5, %102 : vector<1x512xf32>
    %104 = math.tanh %103 : vector<1x512xf32>
    %105 = arith.mulf %5, %104 : vector<1x512xf32>
    %106 = arith.addf %105, %10 : vector<1x512xf32>
    %107 = vector.extract_strided_slice %106 {offsets = [0, 0], sizes = [1, 128], strides = [1, 1]} : vector<1x512xf32> to vector<1x128xf32>
    %108 = vector.extract_strided_slice %106 {offsets = [0, 128], sizes = [1, 128], strides = [1, 1]} : vector<1x512xf32> to vector<1x128xf32>
    %109 = vector.extract_strided_slice %106 {offsets = [0, 256], sizes = [1, 128], strides = [1, 1]} : vector<1x512xf32> to vector<1x128xf32>
    %110 = vector.extract_strided_slice %106 {offsets = [0, 384], sizes = [1, 128], strides = [1, 1]} : vector<1x512xf32> to vector<1x128xf32>
    %111 = arith.mulf %108, %94 : vector<1x128xf32>
    %112 = arith.mulf %107, %110 : vector<1x128xf32>
    %113 = arith.addf %111, %112 : vector<1x128xf32>
    %114 = math.tanh %113 : vector<1x128xf32>
    %115 = arith.mulf %109, %114 : vector<1x128xf32>
    %c4_35 = arith.constant 4 : index
    %c0_36 = arith.constant 0 : index
    %116 = vector.load %arg11[%c4_35, %c0_36] : memref<8x128xf32, #tpu.memory_space<vmem>>, vector<1x128xf32>
    tpu.vector_store %arg11[%c4_35, %c0_36], %115 {strides = array<i32>} : memref<8x128xf32, #tpu.memory_space<vmem>>, vector<1x128xf32>,
    %c5 = arith.constant 5 : index
    %c0_37 = arith.constant 0 : index
    %117 = vector.load %arg12[%c5, %c0_37] : memref<8x512xf32, #tpu.memory_space<vmem>>, vector<1x512xf32>
    %118 = vector.extract_strided_slice %115 {offsets = [0, 0], sizes = [1, 32], strides = [1, 1]} : vector<1x128xf32> to vector<1x32xf32>
    %119 = arith.truncf %118 : vector<1x32xf32> to vector<1x32xbf16>
    %cst_38 = arith.constant dense<0.000000e+00> : vector<1x512xf32>
    %120 = tpu.matmul %119, %19, %cst_38 {dimension_numbers = #tpu.dot_dimension_numbers<[1], [0], [0], [1], [0, 0, 1, 1], [], []>} : vector<1x32xbf16>, vector<32x512xbf16>, vector<1x512xf32> -> vector<1x512xf32>
    %121 = arith.addf %117, %120 : vector<1x512xf32>
    %122 = arith.mulf %5, %121 : vector<1x512xf32>
    %123 = math.tanh %122 : vector<1x512xf32>
    %124 = arith.mulf %5, %123 : vector<1x512xf32>
    %125 = arith.addf %124, %10 : vector<1x512xf32>
    %126 = vector.extract_strided_slice %125 {offsets = [0, 0], sizes = [1, 128], strides = [1, 1]} : vector<1x512xf32> to vector<1x128xf32>
    %127 = vector.extract_strided_slice %125 {offsets = [0, 128], sizes = [1, 128], strides = [1, 1]} : vector<1x512xf32> to vector<1x128xf32>
    %128 = vector.extract_strided_slice %125 {offsets = [0, 256], sizes = [1, 128], strides = [1, 1]} : vector<1x512xf32> to vector<1x128xf32>
    %129 = vector.extract_strided_slice %125 {offsets = [0, 384], sizes = [1, 128], strides = [1, 1]} : vector<1x512xf32> to vector<1x128xf32>
    %130 = arith.mulf %127, %113 : vector<1x128xf32>
    %131 = arith.mulf %126, %129 : vector<1x128xf32>
    %132 = arith.addf %130, %131 : vector<1x128xf32>
    %133 = math.tanh %132 : vector<1x128xf32>
    %134 = arith.mulf %128, %133 : vector<1x128xf32>
    %c5_39 = arith.constant 5 : index
    %c0_40 = arith.constant 0 : index
    %135 = vector.load %arg11[%c5_39, %c0_40] : memref<8x128xf32, #tpu.memory_space<vmem>>, vector<1x128xf32>
    tpu.vector_store %arg11[%c5_39, %c0_40], %134 {strides = array<i32>} : memref<8x128xf32, #tpu.memory_space<vmem>>, vector<1x128xf32>,
    %c6 = arith.constant 6 : index
    %c0_41 = arith.constant 0 : index
    %136 = vector.load %arg12[%c6, %c0_41] : memref<8x512xf32, #tpu.memory_space<vmem>>, vector<1x512xf32>
    %137 = vector.extract_strided_slice %134 {offsets = [0, 0], sizes = [1, 32], strides = [1, 1]} : vector<1x128xf32> to vector<1x32xf32>
    %138 = arith.truncf %137 : vector<1x32xf32> to vector<1x32xbf16>
    %cst_42 = arith.constant dense<0.000000e+00> : vector<1x512xf32>
    %139 = tpu.matmul %138, %19, %cst_42 {dimension_numbers = #tpu.dot_dimension_numbers<[1], [0], [0], [1], [0, 0, 1, 1], [], []>} : vector<1x32xbf16>, vector<32x512xbf16>, vector<1x512xf32> -> vector<1x512xf32>
    %140 = arith.addf %136, %139 : vector<1x512xf32>
    %141 = arith.mulf %5, %140 : vector<1x512xf32>
    %142 = math.tanh %141 : vector<1x512xf32>
    %143 = arith.mulf %5, %142 : vector<1x512xf32>
    %144 = arith.addf %143, %10 : vector<1x512xf32>
    %145 = vector.extract_strided_slice %144 {offsets = [0, 0], sizes = [1, 128], strides = [1, 1]} : vector<1x512xf32> to vector<1x128xf32>
    %146 = vector.extract_strided_slice %144 {offsets = [0, 128], sizes = [1, 128], strides = [1, 1]} : vector<1x512xf32> to vector<1x128xf32>
    %147 = vector.extract_strided_slice %144 {offsets = [0, 256], sizes = [1, 128], strides = [1, 1]} : vector<1x512xf32> to vector<1x128xf32>
    %148 = vector.extract_strided_slice %144 {offsets = [0, 384], sizes = [1, 128], strides = [1, 1]} : vector<1x512xf32> to vector<1x128xf32>
    %149 = arith.mulf %146, %132 : vector<1x128xf32>
    %150 = arith.mulf %145, %148 : vector<1x128xf32>
    %151 = arith.addf %149, %150 : vector<1x128xf32>
    %152 = math.tanh %151 : vector<1x128xf32>
    %153 = arith.mulf %147, %152 : vector<1x128xf32>
    %c6_43 = arith.constant 6 : index
    %c0_44 = arith.constant 0 : index
    %154 = vector.load %arg11[%c6_43, %c0_44] : memref<8x128xf32, #tpu.memory_space<vmem>>, vector<1x128xf32>
    tpu.vector_store %arg11[%c6_43, %c0_44], %153 {strides = array<i32>} : memref<8x128xf32, #tpu.memory_space<vmem>>, vector<1x128xf32>,
    %c7 = arith.constant 7 : index
    %c0_45 = arith.constant 0 : index
    %155 = vector.load %arg12[%c7, %c0_45] : memref<8x512xf32, #tpu.memory_space<vmem>>, vector<1x512xf32>
    %156 = vector.extract_strided_slice %153 {offsets = [0, 0], sizes = [1, 32], strides = [1, 1]} : vector<1x128xf32> to vector<1x32xf32>
    %157 = arith.truncf %156 : vector<1x32xf32> to vector<1x32xbf16>
    %cst_46 = arith.constant dense<0.000000e+00> : vector<1x512xf32>
    %158 = tpu.matmul %157, %19, %cst_46 {dimension_numbers = #tpu.dot_dimension_numbers<[1], [0], [0], [1], [0, 0, 1, 1], [], []>} : vector<1x32xbf16>, vector<32x512xbf16>, vector<1x512xf32> -> vector<1x512xf32>
    %159 = arith.addf %155, %158 : vector<1x512xf32>
    %160 = arith.mulf %5, %159 : vector<1x512xf32>
    %161 = math.tanh %160 : vector<1x512xf32>
    %162 = arith.mulf %5, %161 : vector<1x512xf32>
    %163 = arith.addf %162, %10 : vector<1x512xf32>
    %164 = vector.extract_strided_slice %163 {offsets = [0, 0], sizes = [1, 128], strides = [1, 1]} : vector<1x512xf32> to vector<1x128xf32>
    %165 = vector.extract_strided_slice %163 {offsets = [0, 128], sizes = [1, 128], strides = [1, 1]} : vector<1x512xf32> to vector<1x128xf32>
    %166 = vector.extract_strided_slice %163 {offsets = [0, 256], sizes = [1, 128], strides = [1, 1]} : vector<1x512xf32> to vector<1x128xf32>
    %167 = vector.extract_strided_slice %163 {offsets = [0, 384], sizes = [1, 128], strides = [1, 1]} : vector<1x512xf32> to vector<1x128xf32>
    %168 = arith.mulf %165, %151 : vector<1x128xf32>
    %169 = arith.mulf %164, %167 : vector<1x128xf32>
    %170 = arith.addf %168, %169 : vector<1x128xf32>
    %171 = math.tanh %170 : vector<1x128xf32>
    %172 = arith.mulf %166, %171 : vector<1x128xf32>
    %c7_47 = arith.constant 7 : index
    %c0_48 = arith.constant 0 : index
    %173 = vector.load %arg11[%c7_47, %c0_48] : memref<8x128xf32, #tpu.memory_space<vmem>>, vector<1x128xf32>
    tpu.vector_store %arg11[%c7_47, %c0_48], %172 {strides = array<i32>} : memref<8x128xf32, #tpu.memory_space<vmem>>, vector<1x128xf32>,
    %c0_49 = arith.constant 0 : index
    %c0_50 = arith.constant 0 : index
    %174 = vector.load %arg11[%c0_49, %c0_50] : memref<8x128xf32, #tpu.memory_space<vmem>>, vector<8x128xf32>
    %175 = arith.truncf %174 : vector<8x128xf32> to vector<8x128xbf16>
    %c0_51 = arith.constant 0 : index
    %c0_52 = arith.constant 0 : index
    %176 = vector.load %arg5[%c0_51, %c0_52] : memref<128x512xbf16, #tpu.memory_space<vmem>>, vector<128x512xbf16>
    %cst_53 = arith.constant dense<0.000000e+00> : vector<8x512xf32>
    %177 = tpu.matmul %175, %176, %cst_53 {dimension_numbers = #tpu.dot_dimension_numbers<[1], [0], [0], [1], [0, 0, 1, 1], [], []>} : vector<8x128xbf16>, vector<128x512xbf16>, vector<8x512xf32> -> vector<8x512xf32>
    %c0_54 = arith.constant 0 : index
    %c0_55 = arith.constant 0 : index
    %178 = vector.load %arg7[%c0_54, %c0_55] : memref<1x512xf32, #tpu.memory_space<vmem>>, vector<1x512xf32>
    %179 = vector.broadcast %178 : vector<1x512xf32> to vector<8x512xf32>
    %180 = arith.addf %177, %179 : vector<8x512xf32>
    %c0_56 = arith.constant 0 : index
    %c0_57 = arith.constant 0 : index
    %181 = vector.load %arg12[%c0_56, %c0_57] : memref<8x512xf32, #tpu.memory_space<vmem>>, vector<8x512xf32>
    tpu.vector_store %arg12[%c0_56, %c0_57], %180 {strides = array<i32>} : memref<8x512xf32, #tpu.memory_space<vmem>>, vector<8x512xf32>,
    %c0_58 = arith.constant 0 : index
    %c0_59 = arith.constant 0 : index
    %182 = vector.load %arg6[%c0_58, %c0_59] : memref<32x512xbf16, #tpu.memory_space<vmem>>, vector<32x512xbf16>
    %cst_60 = arith.constant 0.000000e+00 : f32
    %183 = vector.broadcast %cst_60 : f32 to vector<1x128xf32>
    %cst_61 = arith.constant 0.000000e+00 : f32
    %184 = vector.broadcast %cst_61 : f32 to vector<1x128xf32>
    %c0_62 = arith.constant 0 : index
    %c0_63 = arith.constant 0 : index
    %185 = vector.load %arg12[%c0_62, %c0_63] : memref<8x512xf32, #tpu.memory_space<vmem>>, vector<1x512xf32>
    %186 = vector.extract_strided_slice %183 {offsets = [0, 0], sizes = [1, 32], strides = [1, 1]} : vector<1x128xf32> to vector<1x32xf32>
    %187 = arith.truncf %186 : vector<1x32xf32> to vector<1x32xbf16>
    %cst_64 = arith.constant dense<0.000000e+00> : vector<1x512xf32>
    %188 = tpu.matmul %187, %182, %cst_64 {dimension_numbers = #tpu.dot_dimension_numbers<[1], [0], [0], [1], [0, 0, 1, 1], [], []>} : vector<1x32xbf16>, vector<32x512xbf16>, vector<1x512xf32> -> vector<1x512xf32>
    %189 = arith.addf %185, %188 : vector<1x512xf32>
    %190 = arith.mulf %5, %189 : vector<1x512xf32>
    %191 = math.tanh %190 : vector<1x512xf32>
    %192 = arith.mulf %5, %191 : vector<1x512xf32>
    %193 = arith.addf %192, %10 : vector<1x512xf32>
    %194 = vector.extract_strided_slice %193 {offsets = [0, 0], sizes = [1, 128], strides = [1, 1]} : vector<1x512xf32> to vector<1x128xf32>
    %195 = vector.extract_strided_slice %193 {offsets = [0, 128], sizes = [1, 128], strides = [1, 1]} : vector<1x512xf32> to vector<1x128xf32>
    %196 = vector.extract_strided_slice %193 {offsets = [0, 256], sizes = [1, 128], strides = [1, 1]} : vector<1x512xf32> to vector<1x128xf32>
    %197 = vector.extract_strided_slice %193 {offsets = [0, 384], sizes = [1, 128], strides = [1, 1]} : vector<1x512xf32> to vector<1x128xf32>
    %198 = arith.mulf %195, %184 : vector<1x128xf32>
    %199 = arith.mulf %194, %197 : vector<1x128xf32>
    %200 = arith.addf %198, %199 : vector<1x128xf32>
    %201 = math.tanh %200 : vector<1x128xf32>
    %202 = arith.mulf %196, %201 : vector<1x128xf32>
    %c0_65 = arith.constant 0 : index
    %c0_66 = arith.constant 0 : index
    %203 = vector.load %arg11[%c0_65, %c0_66] : memref<8x128xf32, #tpu.memory_space<vmem>>, vector<1x128xf32>
    tpu.vector_store %arg11[%c0_65, %c0_66], %202 {strides = array<i32>} : memref<8x128xf32, #tpu.memory_space<vmem>>, vector<1x128xf32>,
    %c1_67 = arith.constant 1 : index
    %c0_68 = arith.constant 0 : index
    %204 = vector.load %arg12[%c1_67, %c0_68] : memref<8x512xf32, #tpu.memory_space<vmem>>, vector<1x512xf32>
    %205 = vector.extract_strided_slice %202 {offsets = [0, 0], sizes = [1, 32], strides = [1, 1]} : vector<1x128xf32> to vector<1x32xf32>
    %206 = arith.truncf %205 : vector<1x32xf32> to vector<1x32xbf16>
    %cst_69 = arith.constant dense<0.000000e+00> : vector<1x512xf32>
    %207 = tpu.matmul %206, %182, %cst_69 {dimension_numbers = #tpu.dot_dimension_numbers<[1], [0], [0], [1], [0, 0, 1, 1], [], []>} : vector<1x32xbf16>, vector<32x512xbf16>, vector<1x512xf32> -> vector<1x512xf32>
    %208 = arith.addf %204, %207 : vector<1x512xf32>
    %209 = arith.mulf %5, %208 : vector<1x512xf32>
    %210 = math.tanh %209 : vector<1x512xf32>
    %211 = arith.mulf %5, %210 : vector<1x512xf32>
    %212 = arith.addf %211, %10 : vector<1x512xf32>
    %213 = vector.extract_strided_slice %212 {offsets = [0, 0], sizes = [1, 128], strides = [1, 1]} : vector<1x512xf32> to vector<1x128xf32>
    %214 = vector.extract_strided_slice %212 {offsets = [0, 128], sizes = [1, 128], strides = [1, 1]} : vector<1x512xf32> to vector<1x128xf32>
    %215 = vector.extract_strided_slice %212 {offsets = [0, 256], sizes = [1, 128], strides = [1, 1]} : vector<1x512xf32> to vector<1x128xf32>
    %216 = vector.extract_strided_slice %212 {offsets = [0, 384], sizes = [1, 128], strides = [1, 1]} : vector<1x512xf32> to vector<1x128xf32>
    %217 = arith.mulf %214, %200 : vector<1x128xf32>
    %218 = arith.mulf %213, %216 : vector<1x128xf32>
    %219 = arith.addf %217, %218 : vector<1x128xf32>
    %220 = math.tanh %219 : vector<1x128xf32>
    %221 = arith.mulf %215, %220 : vector<1x128xf32>
    %c1_70 = arith.constant 1 : index
    %c0_71 = arith.constant 0 : index
    %222 = vector.load %arg11[%c1_70, %c0_71] : memref<8x128xf32, #tpu.memory_space<vmem>>, vector<1x128xf32>
    tpu.vector_store %arg11[%c1_70, %c0_71], %221 {strides = array<i32>} : memref<8x128xf32, #tpu.memory_space<vmem>>, vector<1x128xf32>,
    %c2_72 = arith.constant 2 : index
    %c0_73 = arith.constant 0 : index
    %223 = vector.load %arg12[%c2_72, %c0_73] : memref<8x512xf32, #tpu.memory_space<vmem>>, vector<1x512xf32>
    %224 = vector.extract_strided_slice %221 {offsets = [0, 0], sizes = [1, 32], strides = [1, 1]} : vector<1x128xf32> to vector<1x32xf32>
    %225 = arith.truncf %224 : vector<1x32xf32> to vector<1x32xbf16>
    %cst_74 = arith.constant dense<0.000000e+00> : vector<1x512xf32>
    %226 = tpu.matmul %225, %182, %cst_74 {dimension_numbers = #tpu.dot_dimension_numbers<[1], [0], [0], [1], [0, 0, 1, 1], [], []>} : vector<1x32xbf16>, vector<32x512xbf16>, vector<1x512xf32> -> vector<1x512xf32>
    %227 = arith.addf %223, %226 : vector<1x512xf32>
    %228 = arith.mulf %5, %227 : vector<1x512xf32>
    %229 = math.tanh %228 : vector<1x512xf32>
    %230 = arith.mulf %5, %229 : vector<1x512xf32>
    %231 = arith.addf %230, %10 : vector<1x512xf32>
    %232 = vector.extract_strided_slice %231 {offsets = [0, 0], sizes = [1, 128], strides = [1, 1]} : vector<1x512xf32> to vector<1x128xf32>
    %233 = vector.extract_strided_slice %231 {offsets = [0, 128], sizes = [1, 128], strides = [1, 1]} : vector<1x512xf32> to vector<1x128xf32>
    %234 = vector.extract_strided_slice %231 {offsets = [0, 256], sizes = [1, 128], strides = [1, 1]} : vector<1x512xf32> to vector<1x128xf32>
    %235 = vector.extract_strided_slice %231 {offsets = [0, 384], sizes = [1, 128], strides = [1, 1]} : vector<1x512xf32> to vector<1x128xf32>
    %236 = arith.mulf %233, %219 : vector<1x128xf32>
    %237 = arith.mulf %232, %235 : vector<1x128xf32>
    %238 = arith.addf %236, %237 : vector<1x128xf32>
    %239 = math.tanh %238 : vector<1x128xf32>
    %240 = arith.mulf %234, %239 : vector<1x128xf32>
    %c2_75 = arith.constant 2 : index
    %c0_76 = arith.constant 0 : index
    %241 = vector.load %arg11[%c2_75, %c0_76] : memref<8x128xf32, #tpu.memory_space<vmem>>, vector<1x128xf32>
    tpu.vector_store %arg11[%c2_75, %c0_76], %240 {strides = array<i32>} : memref<8x128xf32, #tpu.memory_space<vmem>>, vector<1x128xf32>,
    %c3_77 = arith.constant 3 : index
    %c0_78 = arith.constant 0 : index
    %242 = vector.load %arg12[%c3_77, %c0_78] : memref<8x512xf32, #tpu.memory_space<vmem>>, vector<1x512xf32>
    %243 = vector.extract_strided_slice %240 {offsets = [0, 0], sizes = [1, 32], strides = [1, 1]} : vector<1x128xf32> to vector<1x32xf32>
    %244 = arith.truncf %243 : vector<1x32xf32> to vector<1x32xbf16>
    %cst_79 = arith.constant dense<0.000000e+00> : vector<1x512xf32>
    %245 = tpu.matmul %244, %182, %cst_79 {dimension_numbers = #tpu.dot_dimension_numbers<[1], [0], [0], [1], [0, 0, 1, 1], [], []>} : vector<1x32xbf16>, vector<32x512xbf16>, vector<1x512xf32> -> vector<1x512xf32>
    %246 = arith.addf %242, %245 : vector<1x512xf32>
    %247 = arith.mulf %5, %246 : vector<1x512xf32>
    %248 = math.tanh %247 : vector<1x512xf32>
    %249 = arith.mulf %5, %248 : vector<1x512xf32>
    %250 = arith.addf %249, %10 : vector<1x512xf32>
    %251 = vector.extract_strided_slice %250 {offsets = [0, 0], sizes = [1, 128], strides = [1, 1]} : vector<1x512xf32> to vector<1x128xf32>
    %252 = vector.extract_strided_slice %250 {offsets = [0, 128], sizes = [1, 128], strides = [1, 1]} : vector<1x512xf32> to vector<1x128xf32>
    %253 = vector.extract_strided_slice %250 {offsets = [0, 256], sizes = [1, 128], strides = [1, 1]} : vector<1x512xf32> to vector<1x128xf32>
    %254 = vector.extract_strided_slice %250 {offsets = [0, 384], sizes = [1, 128], strides = [1, 1]} : vector<1x512xf32> to vector<1x128xf32>
    %255 = arith.mulf %252, %238 : vector<1x128xf32>
    %256 = arith.mulf %251, %254 : vector<1x128xf32>
    %257 = arith.addf %255, %256 : vector<1x128xf32>
    %258 = math.tanh %257 : vector<1x128xf32>
    %259 = arith.mulf %253, %258 : vector<1x128xf32>
    %c3_80 = arith.constant 3 : index
    %c0_81 = arith.constant 0 : index
    %260 = vector.load %arg11[%c3_80, %c0_81] : memref<8x128xf32, #tpu.memory_space<vmem>>, vector<1x128xf32>
    tpu.vector_store %arg11[%c3_80, %c0_81], %259 {strides = array<i32>} : memref<8x128xf32, #tpu.memory_space<vmem>>, vector<1x128xf32>,
    %c4_82 = arith.constant 4 : index
    %c0_83 = arith.constant 0 : index
    %261 = vector.load %arg12[%c4_82, %c0_83] : memref<8x512xf32, #tpu.memory_space<vmem>>, vector<1x512xf32>
    %262 = vector.extract_strided_slice %259 {offsets = [0, 0], sizes = [1, 32], strides = [1, 1]} : vector<1x128xf32> to vector<1x32xf32>
    %263 = arith.truncf %262 : vector<1x32xf32> to vector<1x32xbf16>
    %cst_84 = arith.constant dense<0.000000e+00> : vector<1x512xf32>
    %264 = tpu.matmul %263, %182, %cst_84 {dimension_numbers = #tpu.dot_dimension_numbers<[1], [0], [0], [1], [0, 0, 1, 1], [], []>} : vector<1x32xbf16>, vector<32x512xbf16>, vector<1x512xf32> -> vector<1x512xf32>
    %265 = arith.addf %261, %264 : vector<1x512xf32>
    %266 = arith.mulf %5, %265 : vector<1x512xf32>
    %267 = math.tanh %266 : vector<1x512xf32>
    %268 = arith.mulf %5, %267 : vector<1x512xf32>
    %269 = arith.addf %268, %10 : vector<1x512xf32>
    %270 = vector.extract_strided_slice %269 {offsets = [0, 0], sizes = [1, 128], strides = [1, 1]} : vector<1x512xf32> to vector<1x128xf32>
    %271 = vector.extract_strided_slice %269 {offsets = [0, 128], sizes = [1, 128], strides = [1, 1]} : vector<1x512xf32> to vector<1x128xf32>
    %272 = vector.extract_strided_slice %269 {offsets = [0, 256], sizes = [1, 128], strides = [1, 1]} : vector<1x512xf32> to vector<1x128xf32>
    %273 = vector.extract_strided_slice %269 {offsets = [0, 384], sizes = [1, 128], strides = [1, 1]} : vector<1x512xf32> to vector<1x128xf32>
    %274 = arith.mulf %271, %257 : vector<1x128xf32>
    %275 = arith.mulf %270, %273 : vector<1x128xf32>
    %276 = arith.addf %274, %275 : vector<1x128xf32>
    %277 = math.tanh %276 : vector<1x128xf32>
    %278 = arith.mulf %272, %277 : vector<1x128xf32>
    %c4_85 = arith.constant 4 : index
    %c0_86 = arith.constant 0 : index
    %279 = vector.load %arg11[%c4_85, %c0_86] : memref<8x128xf32, #tpu.memory_space<vmem>>, vector<1x128xf32>
    tpu.vector_store %arg11[%c4_85, %c0_86], %278 {strides = array<i32>} : memref<8x128xf32, #tpu.memory_space<vmem>>, vector<1x128xf32>,
    %c5_87 = arith.constant 5 : index
    %c0_88 = arith.constant 0 : index
    %280 = vector.load %arg12[%c5_87, %c0_88] : memref<8x512xf32, #tpu.memory_space<vmem>>, vector<1x512xf32>
    %281 = vector.extract_strided_slice %278 {offsets = [0, 0], sizes = [1, 32], strides = [1, 1]} : vector<1x128xf32> to vector<1x32xf32>
    %282 = arith.truncf %281 : vector<1x32xf32> to vector<1x32xbf16>
    %cst_89 = arith.constant dense<0.000000e+00> : vector<1x512xf32>
    %283 = tpu.matmul %282, %182, %cst_89 {dimension_numbers = #tpu.dot_dimension_numbers<[1], [0], [0], [1], [0, 0, 1, 1], [], []>} : vector<1x32xbf16>, vector<32x512xbf16>, vector<1x512xf32> -> vector<1x512xf32>
    %284 = arith.addf %280, %283 : vector<1x512xf32>
    %285 = arith.mulf %5, %284 : vector<1x512xf32>
    %286 = math.tanh %285 : vector<1x512xf32>
    %287 = arith.mulf %5, %286 : vector<1x512xf32>
    %288 = arith.addf %287, %10 : vector<1x512xf32>
    %289 = vector.extract_strided_slice %288 {offsets = [0, 0], sizes = [1, 128], strides = [1, 1]} : vector<1x512xf32> to vector<1x128xf32>
    %290 = vector.extract_strided_slice %288 {offsets = [0, 128], sizes = [1, 128], strides = [1, 1]} : vector<1x512xf32> to vector<1x128xf32>
    %291 = vector.extract_strided_slice %288 {offsets = [0, 256], sizes = [1, 128], strides = [1, 1]} : vector<1x512xf32> to vector<1x128xf32>
    %292 = vector.extract_strided_slice %288 {offsets = [0, 384], sizes = [1, 128], strides = [1, 1]} : vector<1x512xf32> to vector<1x128xf32>
    %293 = arith.mulf %290, %276 : vector<1x128xf32>
    %294 = arith.mulf %289, %292 : vector<1x128xf32>
    %295 = arith.addf %293, %294 : vector<1x128xf32>
    %296 = math.tanh %295 : vector<1x128xf32>
    %297 = arith.mulf %291, %296 : vector<1x128xf32>
    %c5_90 = arith.constant 5 : index
    %c0_91 = arith.constant 0 : index
    %298 = vector.load %arg11[%c5_90, %c0_91] : memref<8x128xf32, #tpu.memory_space<vmem>>, vector<1x128xf32>
    tpu.vector_store %arg11[%c5_90, %c0_91], %297 {strides = array<i32>} : memref<8x128xf32, #tpu.memory_space<vmem>>, vector<1x128xf32>,
    %c6_92 = arith.constant 6 : index
    %c0_93 = arith.constant 0 : index
    %299 = vector.load %arg12[%c6_92, %c0_93] : memref<8x512xf32, #tpu.memory_space<vmem>>, vector<1x512xf32>
    %300 = vector.extract_strided_slice %297 {offsets = [0, 0], sizes = [1, 32], strides = [1, 1]} : vector<1x128xf32> to vector<1x32xf32>
    %301 = arith.truncf %300 : vector<1x32xf32> to vector<1x32xbf16>
    %cst_94 = arith.constant dense<0.000000e+00> : vector<1x512xf32>
    %302 = tpu.matmul %301, %182, %cst_94 {dimension_numbers = #tpu.dot_dimension_numbers<[1], [0], [0], [1], [0, 0, 1, 1], [], []>} : vector<1x32xbf16>, vector<32x512xbf16>, vector<1x512xf32> -> vector<1x512xf32>
    %303 = arith.addf %299, %302 : vector<1x512xf32>
    %304 = arith.mulf %5, %303 : vector<1x512xf32>
    %305 = math.tanh %304 : vector<1x512xf32>
    %306 = arith.mulf %5, %305 : vector<1x512xf32>
    %307 = arith.addf %306, %10 : vector<1x512xf32>
    %308 = vector.extract_strided_slice %307 {offsets = [0, 0], sizes = [1, 128], strides = [1, 1]} : vector<1x512xf32> to vector<1x128xf32>
    %309 = vector.extract_strided_slice %307 {offsets = [0, 128], sizes = [1, 128], strides = [1, 1]} : vector<1x512xf32> to vector<1x128xf32>
    %310 = vector.extract_strided_slice %307 {offsets = [0, 256], sizes = [1, 128], strides = [1, 1]} : vector<1x512xf32> to vector<1x128xf32>
    %311 = vector.extract_strided_slice %307 {offsets = [0, 384], sizes = [1, 128], strides = [1, 1]} : vector<1x512xf32> to vector<1x128xf32>
    %312 = arith.mulf %309, %295 : vector<1x128xf32>
    %313 = arith.mulf %308, %311 : vector<1x128xf32>
    %314 = arith.addf %312, %313 : vector<1x128xf32>
    %315 = math.tanh %314 : vector<1x128xf32>
    %316 = arith.mulf %310, %315 : vector<1x128xf32>
    %c6_95 = arith.constant 6 : index
    %c0_96 = arith.constant 0 : index
    %317 = vector.load %arg11[%c6_95, %c0_96] : memref<8x128xf32, #tpu.memory_space<vmem>>, vector<1x128xf32>
    tpu.vector_store %arg11[%c6_95, %c0_96], %316 {strides = array<i32>} : memref<8x128xf32, #tpu.memory_space<vmem>>, vector<1x128xf32>,
    %c7_97 = arith.constant 7 : index
    %c0_98 = arith.constant 0 : index
    %318 = vector.load %arg12[%c7_97, %c0_98] : memref<8x512xf32, #tpu.memory_space<vmem>>, vector<1x512xf32>
    %319 = vector.extract_strided_slice %316 {offsets = [0, 0], sizes = [1, 32], strides = [1, 1]} : vector<1x128xf32> to vector<1x32xf32>
    %320 = arith.truncf %319 : vector<1x32xf32> to vector<1x32xbf16>
    %cst_99 = arith.constant dense<0.000000e+00> : vector<1x512xf32>
    %321 = tpu.matmul %320, %182, %cst_99 {dimension_numbers = #tpu.dot_dimension_numbers<[1], [0], [0], [1], [0, 0, 1, 1], [], []>} : vector<1x32xbf16>, vector<32x512xbf16>, vector<1x512xf32> -> vector<1x512xf32>
    %322 = arith.addf %318, %321 : vector<1x512xf32>
    %323 = arith.mulf %5, %322 : vector<1x512xf32>
    %324 = math.tanh %323 : vector<1x512xf32>
    %325 = arith.mulf %5, %324 : vector<1x512xf32>
    %326 = arith.addf %325, %10 : vector<1x512xf32>
    %327 = vector.extract_strided_slice %326 {offsets = [0, 0], sizes = [1, 128], strides = [1, 1]} : vector<1x512xf32> to vector<1x128xf32>
    %328 = vector.extract_strided_slice %326 {offsets = [0, 128], sizes = [1, 128], strides = [1, 1]} : vector<1x512xf32> to vector<1x128xf32>
    %329 = vector.extract_strided_slice %326 {offsets = [0, 256], sizes = [1, 128], strides = [1, 1]} : vector<1x512xf32> to vector<1x128xf32>
    %330 = vector.extract_strided_slice %326 {offsets = [0, 384], sizes = [1, 128], strides = [1, 1]} : vector<1x512xf32> to vector<1x128xf32>
    %331 = arith.mulf %328, %314 : vector<1x128xf32>
    %332 = arith.mulf %327, %330 : vector<1x128xf32>
    %333 = arith.addf %331, %332 : vector<1x128xf32>
    %334 = math.tanh %333 : vector<1x128xf32>
    %335 = arith.mulf %329, %334 : vector<1x128xf32>
    %c7_100 = arith.constant 7 : index
    %c0_101 = arith.constant 0 : index
    %336 = vector.load %arg11[%c7_100, %c0_101] : memref<8x128xf32, #tpu.memory_space<vmem>>, vector<1x128xf32>
    tpu.vector_store %arg11[%c7_100, %c0_101], %335 {strides = array<i32>} : memref<8x128xf32, #tpu.memory_space<vmem>>, vector<1x128xf32>,
    %c0_102 = arith.constant 0 : index
    %c0_103 = arith.constant 0 : index
    %337 = vector.load %arg11[%c0_102, %c0_103] : memref<8x128xf32, #tpu.memory_space<vmem>>, vector<8x128xf32>
    %338 = arith.truncf %337 : vector<8x128xf32> to vector<8x128xbf16>
    %c0_104 = arith.constant 0 : index
    %c0_105 = arith.constant 0 : index
    %339 = vector.load %arg8[%c0_104, %c0_105] : memref<128x8xbf16, #tpu.memory_space<vmem>>, vector<128x8xbf16>
    %cst_106 = arith.constant dense<0.000000e+00> : vector<8x8xf32>
    %340 = tpu.matmul %338, %339, %cst_106 {dimension_numbers = #tpu.dot_dimension_numbers<[1], [0], [0], [1], [0, 0, 1, 1], [], []>} : vector<8x128xbf16>, vector<128x8xbf16>, vector<8x8xf32> -> vector<8x8xf32>
    %c0_107 = arith.constant 0 : index
    %c0_108 = arith.constant 0 : index
    %341 = vector.load %arg9[%c0_107, %c0_108] : memref<1x8xf32, #tpu.memory_space<vmem>>, vector<1x8xf32>
    %342 = vector.broadcast %341 : vector<1x8xf32> to vector<8x8xf32>
    %343 = arith.addf %340, %342 : vector<8x8xf32>
    %c0_109 = arith.constant 0 : index
    %c0_110 = arith.constant 0 : index
    %344 = vector.load %arg10[%c0_109, %c0_110] : memref<8x8xf32, #tpu.memory_space<vmem>>, vector<8x8xf32>
    tpu.vector_store %arg10[%c0_109, %c0_110], %343 {strides = array<i32>} : memref<8x8xf32, #tpu.memory_space<vmem>>, vector<8x8xf32>,
    return
  }
  func.func @transform_0(%arg0: i32) -> (i32, i32) {
    %c0_i32 = arith.constant 0 : i32
    %c0_i32_0 = arith.constant 0 : i32
    %c0_i32_1 = arith.constant 0 : i32
    return %c0_i32, %c0_i32_0 : i32, i32
  }
  func.func @transform_1(%arg0: i32) -> (i32, i32) {
    %c0_i32 = arith.constant 0 : i32
    %c0_i32_0 = arith.constant 0 : i32
    %c0_i32_1 = arith.constant 0 : i32
    return %c0_i32, %c0_i32_0 : i32, i32
  }
  func.func @transform_2(%arg0: i32) -> (i32, i32) {
    %c0_i32 = arith.constant 0 : i32
    %c0_i32_0 = arith.constant 0 : i32
    %c0_i32_1 = arith.constant 0 : i32
    return %c0_i32, %c0_i32_0 : i32, i32
  }
  func.func @transform_3(%arg0: i32) -> (i32, i32) {
    %c0_i32 = arith.constant 0 : i32
    %c0_i32_0 = arith.constant 0 : i32
    %c0_i32_1 = arith.constant 0 : i32
    return %c0_i32, %c0_i32_0 : i32, i32
  }
  func.func @transform_4(%arg0: i32) -> (i32, i32) {
    %c0_i32 = arith.constant 0 : i32
    %c0_i32_0 = arith.constant 0 : i32
    %c0_i32_1 = arith.constant 0 : i32
    return %c0_i32, %c0_i32_0 : i32, i32
  }
  func.func @transform_5(%arg0: i32) -> (i32, i32) {
    %c0_i32 = arith.constant 0 : i32
    %c0_i32_0 = arith.constant 0 : i32
    %c0_i32_1 = arith.constant 0 : i32
    return %c0_i32, %c0_i32_0 : i32, i32
  }
  func.func @transform_6(%arg0: i32) -> (i32, i32) {
    %c0_i32 = arith.constant 0 : i32
    %c0_i32_0 = arith.constant 0 : i32
    %c0_i32_1 = arith.constant 0 : i32
    return %c0_i32, %c0_i32_0 : i32, i32
  }
  func.func @transform_7(%arg0: i32) -> (i32, i32) {
    %c0_i32 = arith.constant 0 : i32
    %c0_i32_0 = arith.constant 0 : i32
    %c0_i32_1 = arith.constant 0 : i32
    return %c0_i32, %c0_i32_0 : i32, i32
  }
  func.func @transform_8(%arg0: i32) -> (i32, i32) {
    %c0_i32 = arith.constant 0 : i32
    %c0_i32_0 = arith.constant 0 : i32
    %c0_i32_1 = arith.constant 0 : i32
    return %c0_i32, %c0_i32_0 : i32, i32
  }
  func.func @transform_9(%arg0: i32) -> (i32, i32) {
    %c0_i32 = arith.constant 0 : i32
    %c0_i32_0 = arith.constant 0 : i32
    %c0_i32_1 = arith.constant 0 : i32
    return %c0_i32, %c0_i32_0 : i32, i32
  }
}

</mosaic_0001>

<bundles_post_ra>
// kernel: tpu_custom_call.1
= control target key start
LH: loop header
LB: loop body
LE: loop exit
PB: predicated region body
PF: predicated region fallthrough
CT: control target
= control target key end

     0   :  { %14 = vsyncpa [#allocation5], 0  ;;  %s4328_s0 = inlined_call_operand.hbm [shape: f32[8,16], index: 0, kind: input, shape index: {}]   ;;  %s4329_s1 = inlined_call_operand.hbm [shape: bf16[16,512], index: 1, kind: input, shape index: {}]   ;;  %s4330_s2 = inlined_call_operand.vmem [shape: bf16[32,512], index: 2, kind: input, shape index: {}]   ;;  %s4331_s3 = inlined_call_operand.vmem [shape: f32[1,512], index: 3, kind: input, shape index: {}]   ;;  %s4332_s4 = inlined_call_operand.hbm [shape: bf16[128,512], index: 4, kind: input, shape index: {}]   ;;  %s4333_s5 = inlined_call_operand.hbm [shape: bf16[32,512], index: 5, kind: input, shape index: {}]   ;;  %s4334_s6 = inlined_call_operand.vmem [shape: f32[1,512], index: 6, kind: input, shape index: {}]   ;;  %s4335_s7 = inlined_call_operand.vmem [shape: bf16[128,8], index: 7, kind: input, shape index: {}]   ;;  %s4336_s8 = inlined_call_operand.vmem [shape: f32[1,8], index: 8, kind: input, shape index: {}]   ;;  %s4337_s9 = inlined_call_operand.hbm [shape: f32[8,8], index: 9, kind: output, shape index: {}]  }
   0x1   :  { %15 = vsyncpa [#allocation8], 0 }
   0x2   :  { %16 = vsyncpa [#allocation11], 0 }
   0x3   :  { %17 = vsyncpa [#allocation6], 0  ;;  %s3820_s30 = smov [#allocation7]  }
   0x4   :  { %s33_s10 = sshll.u32 %s3820_s30, 4  ;;  %s34_s10 = int_to_ptr.vmem [resolvable:$true] %s33_s10 }
   0x5   :  { %s3720_s11 = scalar_lea.vmem %s34_s10, 512  ;;  %p3725_p1 = scmp.lt.s32.totalorder %s34_s10, %s34_s10 }
   0x6   :  { %p3721_p0 = scmp.ne.s32.totalorder %s34_s10, %s3720_s11  ;;  %p3726_p2 = scmp.lt.s32.totalorder %s3720_s11, %s3720_s11 }
   0x8   :  { %p3727_p3 = por %p3726_p2, %p3725_p1 }
   0xa   :  { %p3728_p4 = pnand %p3727_p3, %p3721_p0 }
   0xc   :  { %3731 = shalt.err (!%p3728_p4)
}
   0xd   :  { %s3821_s12 = smov 256   ;;  %s3822_s13 = smov 16  }
   0xe   :  { %39 = dma.hbm_to_vmem [thread:$0]  %s4329_s1, 512, %s34_s10, [#allocation8], %s3821_s12, %s3821_s12, %s3822_s13  }
   0xf   :  { %s3823_s16 = smov [#allocation4]   ;;  %s3824_s18 = smov [#allocation9]  }
  0x10   :  { %s24_s17 = sshll.u32 %s3823_s16, 4  ;;  %s49_s19 = sshll.u32 %s3824_s18, 4  ;;  %s25_s17 = int_to_ptr.vmem [resolvable:$true] %s24_s17  ;;  %s50_s19 = int_to_ptr.vmem [resolvable:$true] %s49_s19 }
  0x11   :  { %s3740_s20 = scalar_lea.vmem %s25_s17, 128  ;;  %p3745_p6 = scmp.lt.s32.totalorder %s25_s17, %s25_s17 }
  0x12   :  { %p3741_p5 = scmp.ne.s32.totalorder %s25_s17, %s3740_s20  ;;  %p3746_p7 = scmp.lt.s32.totalorder %s3740_s20, %s3740_s20 }
  0x14   :  { %p3747_p8 = por %p3746_p7, %p3745_p6 }
  0x16   :  { %p3748_p9 = pnand %p3747_p8, %p3741_p5 }
  0x18   :  { %3751 = shalt.err (!%p3748_p9)
}
  0x19   :  { %27 = dma.hbm_to_vmem [thread:$0]  %s4328_s0, 128, %s25_s17, [#allocation5]  }
  0x1a   :  { %s3760_s23 = scalar_lea.vmem %s50_s19, 4096  ;;  %p3765_p11 = scmp.lt.s32.totalorder %s50_s19, %s50_s19 }
  0x1b   :  { %p3761_p10 = scmp.ne.s32.totalorder %s50_s19, %s3760_s23  ;;  %p3766_p12 = scmp.lt.s32.totalorder %s3760_s23, %s3760_s23 }
  0x1d   :  { %p3767_p13 = por %p3766_p12, %p3765_p11 }
  0x1f   :  { %p3768_p0 = pnand %p3767_p13, %p3761_p10 }
  0x21   :  { %3771 = shalt.err (!%p3768_p0)
}
  0x22   :  { %55 = dma.hbm_to_vmem [thread:$0]  %s4332_s4, 4096, %s50_s19, [#allocation8], %s3821_s12, %s3821_s12, %s3822_s13  }
  0x23   :  { %s3825_s25 = smov [#allocation10]  }
  0x24   :  { %s61_s26 = sshll.u32 %s3825_s25, 4  ;;  %s62_s26 = int_to_ptr.vmem [resolvable:$true] %s61_s26 }
  0x25   :  { %s3780_s27 = scalar_lea.vmem %s62_s26, 1024  ;;  %p3785_p2 = scmp.lt.s32.totalorder %s62_s26, %s62_s26 }
  0x26   :  { %p3781_p1 = scmp.ne.s32.totalorder %s62_s26, %s3780_s27  ;;  %p3786_p3 = scmp.lt.s32.totalorder %s3780_s27, %s3780_s27 }
  0x28   :  { %p3787_p4 = por %p3786_p3, %p3785_p2 }
  0x2a   :  { %p3788_p5 = pnand %p3787_p4, %p3781_p1 }
  0x2c   :  { %3791 = shalt.err (!%p3788_p5)
}
  0x2d   :  { %67 = dma.hbm_to_vmem [thread:$0]  %s4333_s5, 1024, %s62_s26, [#allocation11], %s3821_s12, %s3821_s12, %s3822_s13  }
  0x2e   :  { %3812 = dma.done.wait [#allocation5], 128  }
  0x2f   :  { %3813 = vsyncadd [#allocation5], 4294967168 }
  0x30   :  { %3814 = dma.done.wait [#allocation8], 4608  }
  0x31   :  { %3815 = vsyncadd [#allocation8], 4294962688 }
  0x32   :  { %3816 = dma.done.wait [#allocation11], 1024  }
  0x33   :  { %3817 = vsyncadd [#allocation11], 4294966272  ;;  %v3826_v0 = vmov 0   ;;  %v3466_v1 = vld [vmem:[#allocation7 + $0x4] ss:$16 sps:$4 sm:$0xff]   ;;  %v104_v5 = vld [vmem:[#allocation4] sm:$0xff]  ;;  %v112_v15 = vlaneseq }
  0x34   :  { %188 = vmatprep.mubr.bf16.mxu0 %v3826_v0  ;;  %229 = vmatprep.mubr.bf16.mxu1 %v3826_v0  ;;  %v3468_v2 = vld [vmem:[#allocation7 + $0xc] ss:$16 sps:$4 sm:$0xff]   ;;  %v3470_v3 = vld [vmem:[#allocation7] ss:$16 sps:$4 sm:$0xff]   ;;  %v3471_v4 = vld [vmem:[#allocation7 + $0x8] ss:$16 sps:$4 sm:$0xff]   ;;  %v105_v6 = vpack.c.bf16 %v104_v5, %v104_v5 }
  0x35   :  { %170 = vmatprep.subr.bf16.mxu0 %v3466_v1  ;;  %211 = vmatprep.subr.bf16.mxu1 %v3468_v2  ;;  %v3907_v7 = vld [vmem:[%s4330_s2 + $0x24] ss:$16 sps:$4 sm:$0xff]   ;;  %vm152_vm0 = vcmask 130048   ;;  %v3912_v8 = vld [vmem:[%s4330_s2 + $0x20] ss:$16 sps:$4 sm:$0xff]   ;;  %v113_v16 = vshrl.u32 %v112_v15, 7 }
  0x36   :  { %171 = vmatpush1.bf16.msra.mxu0 %v3470_v3  ;;  %212 = vmatpush1.bf16.msra.mxu1 %v3471_v4  ;;  %v3918_v9 = vld [vmem:[%s4330_s2 + $0x4] ss:$16 sps:$4 sm:$0xff]   ;;  %v3925_v10 = vld [vmem:[%s4330_s2] ss:$16 sps:$4 sm:$0xff]   ;;  %v3931_v11 = vld [vmem:[%s4330_s2 + $0x2c] ss:$16 sps:$4 sm:$0xff]  }
  0x37   :  { %307 = vmatprep.subr.bf16.mxu1 %v3907_v7  ;;  %629 = vmatprep.subr.bf16.mxu0 %v3907_v7  ;;  %v3938_v12 = vld [vmem:[%s4330_s2 + $0x28] ss:$16 sps:$4 sm:$0xff]   ;;  %v3945_v13 = vld [vmem:[%s4330_s2 + $0xc] ss:$16 sps:$4 sm:$0xff]   ;;  %v3968_v17 = vsub.s32 0, %v113_v16  ;;  %v3970_v18 = vsub.s32 2, %v113_v16 }
  0x38   :  { %v3953_v14 = vld [vmem:[%s4330_s2 + $0x8] ss:$16 sps:$4 sm:$0xff]   ;;  %v110_v19 = vld [vmem:[%s4331_s3] sm:$0xf]  ;;  %v3975_v20 = vsub.s32 1, %v113_v16  ;;  %v3977_v21 = vsub.s32 3, %v113_v16 }
  0x39   :  { %3339 = vmatmul.mubr.msk.bf16.vlgmr.msra.gmra.mxu0 %vm152_vm0, %v105_v6  ;;  %3340 = vmatmul.mubr.msk.bf16.vlgmr.msra.gmra.mxu1 %vm152_vm0, %v105_v6  ;;  %v115_v22 = vrot.slane %v110_v19, %v3968_v17  ;;  %v123_v23 = vrot.slane %v110_v19, %v3970_v18  ;;  %v3827_v39 = vmov 1966171168   ;;  %vm291_vm1 = vcmask 261120   ;;  %s3830_s15 = smov [#allocation12]  }
  0x3a   :  { %308 = vmatpush1.bf16.msra.mxu1 %v3912_v8  ;;  %327 = vmatprep.mubr.bf16.mxu1 %v3826_v0  ;;  %v119_v24 = vrot.slane %v110_v19, %v3975_v20  ;;  %v127_v25 = vrot.slane %v110_v19, %v3977_v21  ;;  %v384_v40 = vunpack.c.l.s4 %v3827_v39  ;;  %vm3829_vm2 = vmmov 0   ;;  %s3324_s16 = sshll.u32 %s3830_s15, 4  ;;  %s3325_s16 = int_to_ptr.vmem [resolvable:$true] %s3324_s16 }
  0x3b   :  { %309 = vmatprep.subr.bf16.mxu1 %v3918_v9  ;;  %630 = vmatpush1.bf16.msra.mxu0 %v3912_v8  ;;  %vm3316_vm3 = vcmask 64512   ;;  %s3792_s17 = scalar_lea.vmem %s3325_s16, 128  ;;  %p3797_p7 = scmp.lt.s32.totalorder %s3325_s16, %s3325_s16 }
  0x3c   :  { %631 = vmatprep.subr.bf16.mxu0 %v3918_v9  ;;  %649 = vmatprep.mubr.bf16.mxu0 %v3826_v0  ;;  %v385_v43 = vunpack.c.0.s8 %v384_v40  ;;  %p3793_p6 = scmp.ne.s32.totalorder %s3325_s16, %s3792_s17  ;;  %p3798_p8 = scmp.lt.s32.totalorder %s3792_s17, %s3792_s17 }
  0x3e   :  { %310 = vmatpush1.bf16.msra.mxu1 %v3925_v10  ;;  %v3983_v46 = vsub.s32 %v385_v43, %v113_v16  ;;  %p3799_p9 = por %p3798_p8, %p3797_p7 }
  0x3f   :  { %348 = vmatprep.subr.bf16.mxu1 %v3931_v11  ;;  %632 = vmatpush1.bf16.msra.mxu0 %v3925_v10 }
  0x40   :  { %790 = vmatprep.subr.bf16.mxu0 %v3907_v7  ;;  %p3800_p10 = pnand %p3799_p9, %p3793_p6 }
  0x41   :  { %328 = vmatmul.mubr.bf16.vlgmr.msra.gmra.mxu1 %v3826_v0 }
  0x42   :  { %349 = vmatpush1.bf16.msra.mxu1 %v3938_v12  ;;  %368 = vmatprep.mubr.bf16.mxu1 %v3826_v0 }
  0x43   :  { %350 = vmatprep.subr.bf16.mxu1 %v3945_v13 }
  0x46   :  { %351 = vmatpush1.bf16.msra.mxu1 %v3953_v14 }
  0x47   :  { %468 = vmatprep.subr.bf16.mxu1 %v3907_v7 }
  0x49   :  { %369 = vmatmul.mubr.bf16.vlgmr.msra.gmra.mxu1 %v3826_v0 }
  0x4a   :  { %469 = vmatpush1.bf16.msra.mxu1 %v3912_v8  ;;  %488 = vmatprep.mubr.bf16.mxu1 %v3826_v0 }
  0x4b   :  { %470 = vmatprep.subr.bf16.mxu1 %v3918_v9 }
  0x4e   :  { %471 = vmatpush1.bf16.msra.mxu1 %v3925_v10 }
  0x4f   :  { %509 = vmatprep.subr.bf16.mxu1 %v3931_v11 }
  0xf9   :  { %v190_v26 = vpop.f32.mrf.mxu0  ;;  %v231_v27 = vpop.f32.mrf.mxu1 }
  0xfa   :  { %v191_v28 = vadd.f32 %v190_v26, %v115_v22  ;;  %v232_v29 = vadd.f32 %v231_v27, %v123_v23 }
  0xfb   :  { %v192_v30 = vpop.f32.mrf.mxu0  ;;  %v233_v31 = vpop.f32.mrf.mxu1 }
  0xfc   :  { %238 = vst [vmem:[#allocation3] sm:$0xff] %v191_v28  ;;  %240 = vst [vmem:[#allocation3 + $0x10] sm:$0xff] %v232_v29  ;;  %v193_v32 = vadd.f32 %v192_v30, %v119_v24  ;;  %v234_v33 = vadd.f32 %v233_v31, %v127_v25 }
  0xfd   :  { %v235_v34 = vpop.f32.mrf.mxu1  ;;  %v194_v35 = vpop.f32.mrf.mxu0 }
  0xfe   :  { %239 = vst [vmem:[#allocation3 + $0x8] sm:$0xff] %v193_v32  ;;  %241 = vst [vmem:[#allocation3 + $0x18] sm:$0xff] %v234_v33 }
  0xff   :  { %v236_v36 = vpop.f32.mrf.mxu1  ;;  %v195_v37 = vpop.f32.mrf.mxu0 }
 0x101   :  { %v329_v38 = vpop.f32.mrf.mxu1 }
 0x103   :  { %v331_v41 = vpop.f32.mrf.mxu1 }
 0x104   :  { %v381_v47 = vcombine.low %v329_v38, %v331_v41 }
 0x105   :  { %v333_v42 = vpop.f32.mrf.mxu1  ;;  %v250_v56 = vld [vmem:[#allocation3] ss:$8 sm:$0xf] }
 0x106   :  { %v389_v51 = vrot.slane %v381_v47, %v3983_v46 }
 0x107   :  { %v334_v44 = vpop.f32.mrf.mxu1 }
 0x108   :  { %v451_v44 = vld [vmem:[#allocation3 + $0x1] ss:$8 sm:$0xf] }
 0x109   :  { %v370_v45 = vpop.f32.mrf.mxu1 }
 0x10b   :  { %v372_v48 = vpop.f32.mrf.mxu1 }
 0x10c   :  { %v382_v49 = vcombine.low %v370_v45, %v372_v48 }
 0x10d   :  { %v374_v50 = vpop.f32.mrf.mxu1 }
 0x10e   :  { %v396_v52 = vrot.slane %v382_v49, %v3983_v46 }
 0x10f   :  { %v375_v53 = vpop.f32.mrf.mxu1 }
 0x110   :  { %v397_v54 = vcombine.low %v389_v51, %v396_v52 }
 0x112   :  { %v404_v55 = vrot.slane %v397_v54, %v3983_v46 }
 0x114   :  { %v406_v57 = vadd.f32 %v404_v55, %v250_v56 }
 0x116   :  { %v411_v58 = vrot.slane %v406_v57, %v3968_v17  ;;  %v415_v59 = vrot.slane %v406_v57, %v3975_v20  ;;  %v423_v62 = vrot.slane %v406_v57, %v3977_v21  ;;  %v419_v63 = vrot.slane %v406_v57, %v3970_v18 }
 0x118   :  { %v428_v60 = vmul.f32 0.5, %v411_v58  ;;  %v429_v61 = vmul.f32 0.5, %v415_v59  ;;  %v430_v1 = vmul.f32 0.5, %v419_v63 }
 0x11a   :  { %3552 = vtanh.f32 %v428_v60 }
 0x11b   :  { %3554 = vtanh.f32 %v429_v61 }
 0x11c   :  { %3556 = vtanh.f32 %v423_v62 }
 0x11d   :  { %3558 = vtanh.f32 %v430_v1 }
 0x127   :  { %v3553_v2 = vpop.eup %3552 }
 0x128   :  { %v3555_v3 = vpop.eup %3554  ;;  %v436_v4 = vmul.f32 0.5, %v3553_v2 }
 0x129   :  { %v437_v5 = vmul.f32 0.5, %v3555_v3  ;;  %v3557_v15 = vpop.eup %3556 }
 0x12a   :  { %v440_v6 = vadd.f32 0.5, %v436_v4  ;;  %v3559_v24 = vpop.eup %3558 }
 0x12b   :  { %v441_v16 = vadd.f32 0.5, %v437_v5  ;;  %v438_v25 = vmul.f32 0.5, %v3559_v24 }
 0x12c   :  { %v445_v19 = vmul.f32 %v3557_v15, %v440_v6 }
 0x12d   :  { %v444_v22 = vmul.f32 0.0, %v441_v16  ;;  %v442_v26 = vadd.f32 0.5, %v438_v25 }
 0x12f   :  { %v446_v23 = vadd.f32 %v445_v19, %v444_v22 }
 0x131   :  { %3560 = vtanh.f32 %v446_v23 }
 0x13e   :  { %v3561_v27 = vpop.eup %3560 }
 0x13f   :  { %v448_v28 = vmul.f32 %v3561_v27, %v442_v26 }
 0x141   :  { %449 = vst [vmem:[#allocation2] sm:$0x1] %v448_v28  ;;  %v452_v29 = vpack.c.bf16 %v448_v28, %v448_v28 }
 0x143   :  { %3349 = vmatmul.mubr.msk.bf16.vlgmr.msra.gmra.mxu1 %vm291_vm1, %v452_v29 }
 0x144   :  { %510 = vmatpush1.bf16.msra.mxu1 %v3938_v12  ;;  %529 = vmatprep.mubr.bf16.mxu1 %v3826_v0 }
 0x145   :  { %511 = vmatprep.subr.bf16.mxu1 %v3945_v13 }
 0x148   :  { %512 = vmatpush1.bf16.msra.mxu1 %v3953_v14 }
 0x149   :  { %670 = vmatprep.subr.bf16.mxu1 %v3931_v11 }
 0x14b   :  { %3350 = vmatmul.mubr.msk.bf16.vlgmr.msra.gmra.mxu1 %vm291_vm1, %v452_v29 }
 0x14c   :  { %671 = vmatpush1.bf16.msra.mxu1 %v3938_v12  ;;  %690 = vmatprep.mubr.bf16.mxu1 %v3826_v0 }
 0x14d   :  { %672 = vmatprep.subr.bf16.mxu1 %v3945_v13 }
 0x150   :  { %673 = vmatpush1.bf16.msra.mxu1 %v3953_v14 }
 0x151   :  { %831 = vmatprep.subr.bf16.mxu1 %v3931_v11 }
 0x203   :  { %v490_v30 = vpop.f32.mrf.mxu1 }
 0x205   :  { %v492_v31 = vpop.f32.mrf.mxu1 }
 0x206   :  { %v542_v35 = vcombine.low %v490_v30, %v492_v31 }
 0x207   :  { %v494_v32 = vpop.f32.mrf.mxu1 }
 0x208   :  { %v550_v39 = vrot.slane %v542_v35, %v3983_v46 }
 0x209   :  { %v495_v33 = vpop.f32.mrf.mxu1 }
 0x20a   :  { %v612_v33 = vld [vmem:[#allocation3 + $0x2] ss:$8 sm:$0xf] }
 0x20b   :  { %v531_v34 = vpop.f32.mrf.mxu1 }
 0x20d   :  { %v533_v36 = vpop.f32.mrf.mxu1 }
 0x20e   :  { %v543_v37 = vcombine.low %v531_v34, %v533_v36 }
 0x20f   :  { %v535_v38 = vpop.f32.mrf.mxu1 }
 0x210   :  { %v557_v40 = vrot.slane %v543_v37, %v3983_v46 }
 0x211   :  { %v536_v41 = vpop.f32.mrf.mxu1 }
 0x212   :  { %v558_v42 = vcombine.low %v550_v39, %v557_v40 }
 0x214   :  { %v565_v43 = vrot.slane %v558_v42, %v3983_v46 }
 0x216   :  { %v567_v45 = vadd.f32 %v565_v43, %v451_v44 }
 0x218   :  { %v572_v47 = vrot.slane %v567_v45, %v3968_v17  ;;  %v576_v48 = vrot.slane %v567_v45, %v3975_v20  ;;  %v584_v51 = vrot.slane %v567_v45, %v3977_v21  ;;  %v580_v52 = vrot.slane %v567_v45, %v3970_v18 }
 0x21a   :  { %v589_v49 = vmul.f32 0.5, %v572_v47  ;;  %v590_v50 = vmul.f32 0.5, %v576_v48  ;;  %v591_v53 = vmul.f32 0.5, %v580_v52 }
 0x21c   :  { %3562 = vtanh.f32 %v589_v49 }
 0x21d   :  { %3564 = vtanh.f32 %v590_v50 }
 0x21e   :  { %3566 = vtanh.f32 %v584_v51 }
 0x21f   :  { %3568 = vtanh.f32 %v591_v53 }
 0x229   :  { %v3563_v54 = vpop.eup %3562 }
 0x22a   :  { %v3565_v55 = vpop.eup %3564  ;;  %v597_v56 = vmul.f32 0.5, %v3563_v54 }
 0x22b   :  { %v598_v57 = vmul.f32 0.5, %v3565_v55  ;;  %v3567_v59 = vpop.eup %3566 }
 0x22c   :  { %v601_v58 = vadd.f32 0.5, %v597_v56  ;;  %v3569_v1 = vpop.eup %3568 }
 0x22d   :  { %v602_v60 = vadd.f32 0.5, %v598_v57  ;;  %v599_v2 = vmul.f32 0.5, %v3569_v1 }
 0x22e   :  { %v606_v61 = vmul.f32 %v3567_v59, %v601_v58 }
 0x22f   :  { %v605_v62 = vmul.f32 %v602_v60, %v446_v23  ;;  %v603_v3 = vadd.f32 0.5, %v599_v2 }
 0x231   :  { %v607_v63 = vadd.f32 %v606_v61, %v605_v62 }
 0x233   :  { %3570 = vtanh.f32 %v607_v63 }
 0x240   :  { %v3571_v4 = vpop.eup %3570 }
 0x241   :  { %v609_v5 = vmul.f32 %v3571_v4, %v603_v3 }
 0x243   :  { %610 = vst [vmem:[#allocation2 + $0x1] sm:$0x1] %v609_v5  ;;  %v613_v6 = vpack.c.bf16 %v609_v5, %v609_v5 }
 0x245   :  { %3351 = vmatmul.mubr.msk.bf16.vlgmr.msra.gmra.mxu0 %vm291_vm1, %v613_v6  ;;  %3352 = vmatmul.mubr.msk.bf16.vlgmr.msra.gmra.mxu1 %vm291_vm1, %v613_v6 }
 0x246   :  { %791 = vmatpush1.bf16.msra.mxu0 %v3912_v8  ;;  %832 = vmatpush1.bf16.msra.mxu1 %v3938_v12 }
 0x247   :  { %792 = vmatprep.subr.bf16.mxu0 %v3918_v9  ;;  %833 = vmatprep.subr.bf16.mxu1 %v3945_v13 }
 0x248   :  { %810 = vmatprep.mubr.bf16.mxu0 %v3826_v0  ;;  %851 = vmatprep.mubr.bf16.mxu1 %v3826_v0 }
 0x24a   :  { %793 = vmatpush1.bf16.msra.mxu0 %v3925_v10  ;;  %834 = vmatpush1.bf16.msra.mxu1 %v3953_v14 }
 0x24b   :  { %951 = vmatprep.subr.bf16.mxu0 %v3907_v7  ;;  %992 = vmatprep.subr.bf16.mxu1 %v3931_v11 }
 0x305   :  { %v651_v15 = vpop.f32.mrf.mxu0  ;;  %v692_v16 = vpop.f32.mrf.mxu1 }
 0x307   :  { %v653_v19 = vpop.f32.mrf.mxu0  ;;  %v694_v22 = vpop.f32.mrf.mxu1 }
 0x308   :  { %v703_v23 = vcombine.low %v651_v15, %v653_v19  ;;  %v704_v24 = vcombine.low %v692_v16, %v694_v22  ;;  %v773_v22 = vld [vmem:[#allocation3 + $0x3] ss:$8 sm:$0xf] }
 0x309   :  { %v655_v25 = vpop.f32.mrf.mxu0  ;;  %v696_v26 = vpop.f32.mrf.mxu1 }
 0x30a   :  { %v711_v27 = vrot.slane %v703_v23, %v3983_v46  ;;  %v718_v28 = vrot.slane %v704_v24, %v3983_v46 }
 0x30b   :  { %v656_v29 = vpop.f32.mrf.mxu0  ;;  %v697_v30 = vpop.f32.mrf.mxu1 }
 0x30c   :  { %v719_v31 = vcombine.low %v711_v27, %v718_v28 }
 0x30e   :  { %v726_v32 = vrot.slane %v719_v31, %v3983_v46 }
 0x310   :  { %v728_v34 = vadd.f32 %v726_v32, %v612_v33 }
 0x312   :  { %v733_v35 = vrot.slane %v728_v34, %v3968_v17  ;;  %v737_v36 = vrot.slane %v728_v34, %v3975_v20  ;;  %v745_v39 = vrot.slane %v728_v34, %v3977_v21  ;;  %v741_v40 = vrot.slane %v728_v34, %v3970_v18 }
 0x314   :  { %v750_v37 = vmul.f32 0.5, %v733_v35  ;;  %v751_v38 = vmul.f32 0.5, %v737_v36  ;;  %v752_v41 = vmul.f32 0.5, %v741_v40 }
 0x316   :  { %3572 = vtanh.f32 %v750_v37 }
 0x317   :  { %3574 = vtanh.f32 %v751_v38 }
 0x318   :  { %3576 = vtanh.f32 %v745_v39 }
 0x319   :  { %3578 = vtanh.f32 %v752_v41 }
 0x323   :  { %v3573_v42 = vpop.eup %3572 }
 0x324   :  { %v3575_v43 = vpop.eup %3574  ;;  %v758_v44 = vmul.f32 0.5, %v3573_v42 }
 0x325   :  { %v759_v45 = vmul.f32 0.5, %v3575_v43  ;;  %v3577_v48 = vpop.eup %3576 }
 0x326   :  { %v762_v47 = vadd.f32 0.5, %v758_v44  ;;  %v3579_v53 = vpop.eup %3578 }
 0x327   :  { %v763_v49 = vadd.f32 0.5, %v759_v45  ;;  %v760_v54 = vmul.f32 0.5, %v3579_v53 }
 0x328   :  { %v767_v50 = vmul.f32 %v3577_v48, %v762_v47 }
 0x329   :  { %v766_v51 = vmul.f32 %v763_v49, %v607_v63  ;;  %v764_v55 = vadd.f32 0.5, %v760_v54 }
 0x32b   :  { %v768_v52 = vadd.f32 %v767_v50, %v766_v51 }
 0x32d   :  { %3580 = vtanh.f32 %v768_v52 }
 0x33a   :  { %v3581_v56 = vpop.eup %3580 }
 0x33b   :  { %v770_v57 = vmul.f32 %v3581_v56, %v764_v55 }
 0x33d   :  { %771 = vst [vmem:[#allocation2 + $0x2] sm:$0x1] %v770_v57  ;;  %v774_v58 = vpack.c.bf16 %v770_v57, %v770_v57 }
 0x33f   :  { %3353 = vmatmul.mubr.msk.bf16.vlgmr.msra.gmra.mxu0 %vm291_vm1, %v774_v58  ;;  %3354 = vmatmul.mubr.msk.bf16.vlgmr.msra.gmra.mxu1 %vm291_vm1, %v774_v58 }
 0x340   :  { %952 = vmatpush1.bf16.msra.mxu0 %v3912_v8  ;;  %993 = vmatpush1.bf16.msra.mxu1 %v3938_v12 }
 0x341   :  { %953 = vmatprep.subr.bf16.mxu0 %v3918_v9  ;;  %994 = vmatprep.subr.bf16.mxu1 %v3945_v13 }
 0x342   :  { %971 = vmatprep.mubr.bf16.mxu0 %v3826_v0  ;;  %1012 = vmatprep.mubr.bf16.mxu1 %v3826_v0 }
 0x344   :  { %954 = vmatpush1.bf16.msra.mxu0 %v3925_v10  ;;  %995 = vmatpush1.bf16.msra.mxu1 %v3953_v14 }
 0x345   :  { %1112 = vmatprep.subr.bf16.mxu0 %v3907_v7  ;;  %1153 = vmatprep.subr.bf16.mxu1 %v3931_v11 }
 0x3ff   :  { %v812_v59 = vpop.f32.mrf.mxu0  ;;  %v853_v60 = vpop.f32.mrf.mxu1 }
 0x401   :  { %v814_v61 = vpop.f32.mrf.mxu0  ;;  %v855_v62 = vpop.f32.mrf.mxu1 }
 0x402   :  { %v864_v63 = vcombine.low %v812_v59, %v814_v61  ;;  %v865_v1 = vcombine.low %v853_v60, %v855_v62  ;;  %v934_v62 = vld [vmem:[#allocation3 + $0x4] ss:$8 sm:$0xf] }
 0x403   :  { %v816_v2 = vpop.f32.mrf.mxu0  ;;  %v857_v3 = vpop.f32.mrf.mxu1 }
 0x404   :  { %v872_v4 = vrot.slane %v864_v63, %v3983_v46  ;;  %v879_v5 = vrot.slane %v865_v1, %v3983_v46 }
 0x405   :  { %v817_v6 = vpop.f32.mrf.mxu0  ;;  %v858_v15 = vpop.f32.mrf.mxu1 }
 0x406   :  { %v880_v16 = vcombine.low %v872_v4, %v879_v5 }
 0x408   :  { %v887_v19 = vrot.slane %v880_v16, %v3983_v46 }
 0x40a   :  { %v889_v23 = vadd.f32 %v887_v19, %v773_v22 }
 0x40c   :  { %v894_v24 = vrot.slane %v889_v23, %v3968_v17  ;;  %v898_v25 = vrot.slane %v889_v23, %v3975_v20  ;;  %v906_v28 = vrot.slane %v889_v23, %v3977_v21  ;;  %v902_v29 = vrot.slane %v889_v23, %v3970_v18 }
 0x40e   :  { %v911_v26 = vmul.f32 0.5, %v894_v24  ;;  %v912_v27 = vmul.f32 0.5, %v898_v25  ;;  %v913_v30 = vmul.f32 0.5, %v902_v29 }
 0x410   :  { %3582 = vtanh.f32 %v911_v26 }
 0x411   :  { %3584 = vtanh.f32 %v912_v27 }
 0x412   :  { %3586 = vtanh.f32 %v906_v28 }
 0x413   :  { %3588 = vtanh.f32 %v913_v30 }
 0x41d   :  { %v3583_v31 = vpop.eup %3582 }
 0x41e   :  { %v3585_v32 = vpop.eup %3584  ;;  %v919_v33 = vmul.f32 0.5, %v3583_v31 }
 0x41f   :  { %v920_v34 = vmul.f32 0.5, %v3585_v32  ;;  %v3587_v36 = vpop.eup %3586 }
 0x420   :  { %v923_v35 = vadd.f32 0.5, %v919_v33  ;;  %v3589_v41 = vpop.eup %3588 }
 0x421   :  { %v924_v37 = vadd.f32 0.5, %v920_v34  ;;  %v921_v42 = vmul.f32 0.5, %v3589_v41 }
 0x422   :  { %v928_v38 = vmul.f32 %v3587_v36, %v923_v35 }
 0x423   :  { %v927_v39 = vmul.f32 %v924_v37, %v768_v52  ;;  %v925_v43 = vadd.f32 0.5, %v921_v42 }
 0x425   :  { %v929_v40 = vadd.f32 %v928_v38, %v927_v39 }
 0x427   :  { %3590 = vtanh.f32 %v929_v40 }
 0x434   :  { %v3591_v44 = vpop.eup %3590 }
 0x435   :  { %v931_v45 = vmul.f32 %v3591_v44, %v925_v43 }
 0x437   :  { %932 = vst [vmem:[#allocation2 + $0x3] sm:$0x1] %v931_v45  ;;  %v935_v47 = vpack.c.bf16 %v931_v45, %v931_v45 }
 0x439   :  { %3355 = vmatmul.mubr.msk.bf16.vlgmr.msra.gmra.mxu0 %vm291_vm1, %v935_v47  ;;  %3356 = vmatmul.mubr.msk.bf16.vlgmr.msra.gmra.mxu1 %vm291_vm1, %v935_v47 }
 0x43a   :  { %1113 = vmatpush1.bf16.msra.mxu0 %v3912_v8  ;;  %1154 = vmatpush1.bf16.msra.mxu1 %v3938_v12 }
 0x43b   :  { %1114 = vmatprep.subr.bf16.mxu0 %v3918_v9  ;;  %1155 = vmatprep.subr.bf16.mxu1 %v3945_v13 }
 0x43c   :  { %1132 = vmatprep.mubr.bf16.mxu0 %v3826_v0  ;;  %1173 = vmatprep.mubr.bf16.mxu1 %v3826_v0 }
 0x43e   :  { %1115 = vmatpush1.bf16.msra.mxu0 %v3925_v10  ;;  %1156 = vmatpush1.bf16.msra.mxu1 %v3953_v14 }
 0x43f   :  { %1273 = vmatprep.subr.bf16.mxu0 %v3907_v7  ;;  %1314 = vmatprep.subr.bf16.mxu1 %v3931_v11 }
 0x4f9   :  { %v973_v48 = vpop.f32.mrf.mxu0  ;;  %v1014_v49 = vpop.f32.mrf.mxu1 }
 0x4fb   :  { %v975_v50 = vpop.f32.mrf.mxu0  ;;  %v1016_v51 = vpop.f32.mrf.mxu1 }
 0x4fc   :  { %v1025_v52 = vcombine.low %v973_v48, %v975_v50  ;;  %v1026_v53 = vcombine.low %v1014_v49, %v1016_v51 }
 0x4fd   :  { %v977_v54 = vpop.f32.mrf.mxu0  ;;  %v1018_v55 = vpop.f32.mrf.mxu1 }
 0x4fe   :  { %v1033_v56 = vrot.slane %v1025_v52, %v3983_v46  ;;  %v1040_v57 = vrot.slane %v1026_v53, %v3983_v46 }
 0x4ff   :  { %v978_v58 = vpop.f32.mrf.mxu0  ;;  %v1019_v59 = vpop.f32.mrf.mxu1 }
 0x500   :  { %v1041_v60 = vcombine.low %v1033_v56, %v1040_v57 }
 0x502   :  { %v1048_v61 = vrot.slane %v1041_v60, %v3983_v46 }
 0x504   :  { %v1050_v63 = vadd.f32 %v1048_v61, %v934_v62 }
 0x506   :  { %v1055_v1 = vrot.slane %v1050_v63, %v3968_v17  ;;  %v1059_v2 = vrot.slane %v1050_v63, %v3975_v20  ;;  %v1067_v5 = vrot.slane %v1050_v63, %v3977_v21  ;;  %v1063_v6 = vrot.slane %v1050_v63, %v3970_v18 }
 0x508   :  { %v1072_v3 = vmul.f32 0.5, %v1055_v1  ;;  %v1073_v4 = vmul.f32 0.5, %v1059_v2  ;;  %v1074_v15 = vmul.f32 0.5, %v1063_v6 }
 0x50a   :  { %3592 = vtanh.f32 %v1072_v3 }
 0x50b   :  { %3594 = vtanh.f32 %v1073_v4 }
 0x50c   :  { %3596 = vtanh.f32 %v1067_v5 }
 0x50d   :  { %3598 = vtanh.f32 %v1074_v15 }
 0x517   :  { %v3593_v16 = vpop.eup %3592 }
 0x518   :  { %v3595_v19 = vpop.eup %3594  ;;  %v1080_v22 = vmul.f32 0.5, %v3593_v16 }
 0x519   :  { %v1081_v23 = vmul.f32 0.5, %v3595_v19  ;;  %v3597_v25 = vpop.eup %3596 }
 0x51a   :  { %v1084_v24 = vadd.f32 0.5, %v1080_v22  ;;  %v3599_v30 = vpop.eup %3598 }
 0x51b   :  { %v1085_v26 = vadd.f32 0.5, %v1081_v23  ;;  %v1082_v31 = vmul.f32 0.5, %v3599_v30 }
 0x51c   :  { %v1089_v27 = vmul.f32 %v3597_v25, %v1084_v24 }
 0x51d   :  { %v1088_v28 = vmul.f32 %v1085_v26, %v929_v40  ;;  %v1086_v32 = vadd.f32 0.5, %v1082_v31 }
 0x51f   :  { %v1090_v29 = vadd.f32 %v1089_v27, %v1088_v28 }
 0x521   :  { %3600 = vtanh.f32 %v1090_v29 }
 0x52e   :  { %v3601_v33 = vpop.eup %3600 }
 0x52f   :  { %v1092_v34 = vmul.f32 %v3601_v33, %v1086_v32 }
 0x531   :  { %1093 = vst [vmem:[#allocation2 + $0x4] sm:$0x1] %v1092_v34  ;;  %v1096_v35 = vpack.c.bf16 %v1092_v34, %v1092_v34 }
 0x533   :  { %3357 = vmatmul.mubr.msk.bf16.vlgmr.msra.gmra.mxu0 %vm291_vm1, %v1096_v35  ;;  %3358 = vmatmul.mubr.msk.bf16.vlgmr.msra.gmra.mxu1 %vm291_vm1, %v1096_v35 }
 0x534   :  { %1274 = vmatpush1.bf16.msra.mxu0 %v3912_v8  ;;  %1315 = vmatpush1.bf16.msra.mxu1 %v3938_v12 }
 0x535   :  { %1275 = vmatprep.subr.bf16.mxu0 %v3918_v9  ;;  %1316 = vmatprep.subr.bf16.mxu1 %v3945_v13 }
 0x536   :  { %1293 = vmatprep.mubr.bf16.mxu0 %v3826_v0  ;;  %1334 = vmatprep.mubr.bf16.mxu1 %v3826_v0 }
 0x538   :  { %1276 = vmatpush1.bf16.msra.mxu0 %v3925_v10  ;;  %1317 = vmatpush1.bf16.msra.mxu1 %v3953_v14 }
 0x539   :  { %1434 = vmatprep.subr.bf16.mxu0 %v3907_v7  ;;  %1475 = vmatprep.subr.bf16.mxu1 %v3931_v11  ;;  %v1095_v7 = vld [vmem:[#allocation3 + $0x5] ss:$8 sm:$0xf] }
 0x5f3   :  { %v1134_v36 = vpop.f32.mrf.mxu0  ;;  %v1175_v37 = vpop.f32.mrf.mxu1 }
 0x5f5   :  { %v1136_v38 = vpop.f32.mrf.mxu0  ;;  %v1177_v39 = vpop.f32.mrf.mxu1 }
 0x5f6   :  { %v1186_v40 = vcombine.low %v1134_v36, %v1136_v38  ;;  %v1187_v41 = vcombine.low %v1175_v37, %v1177_v39 }
 0x5f7   :  { %v1138_v42 = vpop.f32.mrf.mxu0  ;;  %v1179_v43 = vpop.f32.mrf.mxu1 }
 0x5f8   :  { %v1194_v44 = vrot.slane %v1186_v40, %v3983_v46  ;;  %v1201_v45 = vrot.slane %v1187_v41, %v3983_v46 }
 0x5f9   :  { %v1139_v47 = vpop.f32.mrf.mxu0  ;;  %v1180_v48 = vpop.f32.mrf.mxu1 }
 0x5fa   :  { %v1202_v49 = vcombine.low %v1194_v44, %v1201_v45 }
 0x5fc   :  { %v1209_v50 = vrot.slane %v1202_v49, %v3983_v46 }
 0x5fe   :  { %v1211_v51 = vadd.f32 %v1209_v50, %v1095_v7 }
 0x600   :  { %v1216_v11 = vrot.slane %v1211_v51, %v3968_v17  ;;  %v1220_v52 = vrot.slane %v1211_v51, %v3975_v20  ;;  %v1228_v55 = vrot.slane %v1211_v51, %v3977_v21  ;;  %v1224_v56 = vrot.slane %v1211_v51, %v3970_v18 }
 0x602   :  { %v1233_v53 = vmul.f32 0.5, %v1216_v11  ;;  %v1234_v54 = vmul.f32 0.5, %v1220_v52  ;;  %v1235_v57 = vmul.f32 0.5, %v1224_v56  ;;  %v3489_v56 = vld [vmem:[#allocation9 + $0xec] ss:$16 sps:$4 sm:$0xff]  }
 0x604   :  { %3602 = vtanh.f32 %v1233_v53 }
 0x605   :  { %3604 = vtanh.f32 %v1234_v54 }
 0x606   :  { %3606 = vtanh.f32 %v1228_v55  ;;  %v3486_v55 = vld [vmem:[#allocation9 + $0xe4] ss:$16 sps:$4 sm:$0xff]  }
 0x607   :  { %3608 = vtanh.f32 %v1235_v57  ;;  %v3484_v57 = vld [vmem:[#allocation9 + $0xe0] ss:$16 sps:$4 sm:$0xff]  }
 0x611   :  { %v3603_v58 = vpop.eup %3602 }
 0x612   :  { %v3605_v59 = vpop.eup %3604  ;;  %v1241_v60 = vmul.f32 0.5, %v3603_v58  ;;  %v3487_v58 = vld [vmem:[#allocation9 + $0xe8] ss:$16 sps:$4 sm:$0xff]  }
 0x613   :  { %v1242_v61 = vmul.f32 0.5, %v3605_v59  ;;  %v3607_v63 = vpop.eup %3606  ;;  %v3492_v59 = vld [vmem:[#allocation9 + $0xc4] ss:$16 sps:$4 sm:$0xff]  }
 0x614   :  { %v1245_v62 = vadd.f32 0.5, %v1241_v60  ;;  %v3609_v5 = vpop.eup %3608  ;;  %v3495_v60 = vld [vmem:[#allocation9 + $0xcc] ss:$16 sps:$4 sm:$0xff]  }
 0x615   :  { %v1246_v1 = vadd.f32 0.5, %v1242_v61  ;;  %v1243_v6 = vmul.f32 0.5, %v3609_v5  ;;  %v3490_v61 = vld [vmem:[#allocation9 + $0xc0] ss:$16 sps:$4 sm:$0xff]   ;;  %v3507_v5 = vld [vmem:[#allocation9 + $0x8c] ss:$16 sps:$4 sm:$0xff]  }
 0x616   :  { %v1250_v2 = vmul.f32 %v3607_v63, %v1245_v62  ;;  %v3493_v62 = vld [vmem:[#allocation9 + $0xc8] ss:$16 sps:$4 sm:$0xff]   ;;  %v3498_v63 = vld [vmem:[#allocation9 + $0xa4] ss:$16 sps:$4 sm:$0xff]  }
 0x617   :  { %v1249_v3 = vmul.f32 %v1246_v1, %v1090_v29  ;;  %v1247_v15 = vadd.f32 0.5, %v1243_v6  ;;  %v3501_v1 = vld [vmem:[#allocation9 + $0xac] ss:$16 sps:$4 sm:$0xff]   ;;  %v3502_v6 = vld [vmem:[#allocation9 + $0x80] ss:$16 sps:$4 sm:$0xff]  }
 0x619   :  { %v1251_v4 = vadd.f32 %v1250_v2, %v1249_v3  ;;  %v3496_v2 = vld [vmem:[#allocation9 + $0xa0] ss:$16 sps:$4 sm:$0xff]   ;;  %v3499_v3 = vld [vmem:[#allocation9 + $0xa8] ss:$16 sps:$4 sm:$0xff]  }
 0x61b   :  { %3610 = vtanh.f32 %v1251_v4 }
 0x628   :  { %v3611_v16 = vpop.eup %3610 }
 0x629   :  { %v1253_v19 = vmul.f32 %v3611_v16, %v1247_v15  ;;  %v3505_v15 = vld [vmem:[#allocation9 + $0x88] ss:$16 sps:$4 sm:$0xff]   ;;  %v3510_v16 = vld [vmem:[#allocation9 + $0x64] ss:$16 sps:$4 sm:$0xff]  }
 0x62b   :  { %1254 = vst [vmem:[#allocation2 + $0x5] sm:$0x1] %v1253_v19  ;;  %v1257_v22 = vpack.c.bf16 %v1253_v19, %v1253_v19  ;;  %v3513_v19 = vld [vmem:[#allocation9 + $0x6c] ss:$16 sps:$4 sm:$0xff]  }
 0x62d   :  { %3359 = vmatmul.mubr.msk.bf16.vlgmr.msra.gmra.mxu0 %vm291_vm1, %v1257_v22  ;;  %3360 = vmatmul.mubr.msk.bf16.vlgmr.msra.gmra.mxu1 %vm291_vm1, %v1257_v22  ;;  %v3508_v22 = vld [vmem:[#allocation9 + $0x60] ss:$16 sps:$4 sm:$0xff]  }
 0x62e   :  { %1435 = vmatpush1.bf16.msra.mxu0 %v3912_v8  ;;  %1476 = vmatpush1.bf16.msra.mxu1 %v3938_v12 }
 0x62f   :  { %1436 = vmatprep.subr.bf16.mxu0 %v3918_v9  ;;  %1477 = vmatprep.subr.bf16.mxu1 %v3945_v13 }
 0x630   :  { %1454 = vmatprep.mubr.bf16.mxu0 %v3826_v0  ;;  %1495 = vmatprep.mubr.bf16.mxu1 %v3826_v0 }
 0x632   :  { %1437 = vmatpush1.bf16.msra.mxu0 %v3925_v10  ;;  %1478 = vmatpush1.bf16.msra.mxu1 %v3953_v14  ;;  %v1256_v10 = vld [vmem:[#allocation3 + $0x6] ss:$8 sm:$0xf] }
 0x633   :  { %1793 = vmatprep.subr.bf16.mxu0 %v3486_v55  ;;  %1834 = vmatprep.subr.bf16.mxu1 %v3489_v56 }
 0x6ed   :  { %v1295_v23 = vpop.f32.mrf.mxu0  ;;  %v1336_v24 = vpop.f32.mrf.mxu1 }
 0x6ef   :  { %v1297_v25 = vpop.f32.mrf.mxu0  ;;  %v1338_v26 = vpop.f32.mrf.mxu1 }
 0x6f0   :  { %v1347_v27 = vcombine.low %v1295_v23, %v1297_v25  ;;  %v1348_v8 = vcombine.low %v1336_v24, %v1338_v26  ;;  %v3511_v23 = vld [vmem:[#allocation9 + $0x68] ss:$16 sps:$4 sm:$0xff]   ;;  %v3516_v24 = vld [vmem:[#allocation9 + $0x44] ss:$16 sps:$4 sm:$0xff]   ;;  %v3519_v25 = vld [vmem:[#allocation9 + $0x4c] ss:$16 sps:$4 sm:$0xff]  }
 0x6f1   :  { %v1299_v28 = vpop.f32.mrf.mxu0  ;;  %v1340_v12 = vpop.f32.mrf.mxu1  ;;  %v3514_v26 = vld [vmem:[#allocation9 + $0x40] ss:$16 sps:$4 sm:$0xff]  }
 0x6f2   :  { %v1355_v9 = vrot.slane %v1347_v27, %v3983_v46  ;;  %v1362_v13 = vrot.slane %v1348_v8, %v3983_v46  ;;  %v3517_v27 = vld [vmem:[#allocation9 + $0x48] ss:$16 sps:$4 sm:$0xff]   ;;  %v3520_v8 = vld [vmem:[#allocation9 + $0x20] ss:$16 sps:$4 sm:$0xff]   ;;  %v3522_v28 = vld [vmem:[#allocation9 + $0x24] ss:$16 sps:$4 sm:$0xff]  }
 0x6f3   :  { %v1300_v29 = vpop.f32.mrf.mxu0  ;;  %v1341_v30 = vpop.f32.mrf.mxu1  ;;  %v3523_v12 = vld [vmem:[#allocation9 + $0x28] ss:$16 sps:$4 sm:$0xff]  }
 0x6f4   :  { %v1363_v31 = vcombine.low %v1355_v9, %v1362_v13  ;;  %v3525_v9 = vld [vmem:[#allocation9 + $0x2c] ss:$16 sps:$4 sm:$0xff]   ;;  %v3528_v13 = vld [vmem:[#allocation9 + $0x4] ss:$16 sps:$4 sm:$0xff]   ;;  %v3526_v30 = vld [vmem:[#allocation9] ss:$16 sps:$4 sm:$0xff]  }
 0x6f5   :  { %v3531_v29 = vld [vmem:[#allocation9 + $0xc] ss:$16 sps:$4 sm:$0xff]  }
 0x6f6   :  { %v1370_v32 = vrot.slane %v1363_v31, %v3983_v46  ;;  %v3529_v31 = vld [vmem:[#allocation9 + $0x8] ss:$16 sps:$4 sm:$0xff]  }
 0x6f8   :  { %v1372_v33 = vadd.f32 %v1370_v32, %v1256_v10  ;;  %v4111_v32 = vld [vmem:[#allocation10 + $0x24] ss:$16 sps:$4 sm:$0xff]   ;;  %v4113_v10 = vld [vmem:[#allocation10 + $0x2c] ss:$16 sps:$4 sm:$0xff]  }
 0x6fa   :  { %v1377_v14 = vrot.slane %v1372_v33, %v3968_v17  ;;  %v1381_v34 = vrot.slane %v1372_v33, %v3975_v20  ;;  %v1389_v37 = vrot.slane %v1372_v33, %v3977_v21  ;;  %v1385_v38 = vrot.slane %v1372_v33, %v3970_v18 }
 0x6fc   :  { %v1394_v35 = vmul.f32 0.5, %v1377_v14  ;;  %v1395_v36 = vmul.f32 0.5, %v1381_v34  ;;  %v1396_v39 = vmul.f32 0.5, %v1385_v38 }
 0x6fe   :  { %3612 = vtanh.f32 %v1394_v35 }
 0x6ff   :  { %3614 = vtanh.f32 %v1395_v36 }
 0x700   :  { %3616 = vtanh.f32 %v1389_v37 }
 0x701   :  { %3618 = vtanh.f32 %v1396_v39 }
 0x70b   :  { %v3613_v40 = vpop.eup %3612 }
 0x70c   :  { %v3615_v41 = vpop.eup %3614  ;;  %v1402_v42 = vmul.f32 0.5, %v3613_v40 }
 0x70d   :  { %v1403_v43 = vmul.f32 0.5, %v3615_v41  ;;  %v3617_v45 = vpop.eup %3616 }
 0x70e   :  { %v1406_v44 = vadd.f32 0.5, %v1402_v42  ;;  %v3619_v7 = vpop.eup %3618 }
 0x70f   :  { %v1407_v47 = vadd.f32 0.5, %v1403_v43  ;;  %v1404_v51 = vmul.f32 0.5, %v3619_v7 }
 0x710   :  { %v1411_v48 = vmul.f32 %v3617_v45, %v1406_v44 }
 0x711   :  { %v1410_v49 = vmul.f32 %v1407_v47, %v1251_v4  ;;  %v1408_v11 = vadd.f32 0.5, %v1404_v51  ;;  %v3504_v4 = vld [vmem:[#allocation9 + $0x84] ss:$16 sps:$4 sm:$0xff]  }
 0x712   :  { %v1417_v47 = vld [vmem:[#allocation3 + $0x7] ss:$8 sm:$0xf] }
 0x713   :  { %v4104_v50 = vadd.f32 %v1411_v48, %v1410_v49 }
 0x715   :  { %3620 = vtanh.f32 %v4104_v50 }
 0x722   :  { %v3621_v52 = vpop.eup %3620 }
 0x723   :  { %v1414_v53 = vmul.f32 %v3621_v52, %v1408_v11 }
 0x725   :  { %1415 = vst [vmem:[#allocation2 + $0x6] sm:$0x1] %v1414_v53  ;;  %v1418_v54 = vpack.c.bf16 %v1414_v53, %v1414_v53 }
 0x727   :  { %3361 = vmatmul.mubr.msk.bf16.vlgmr.msra.gmra.mxu0 %vm291_vm1, %v1418_v54  ;;  %3362 = vmatmul.mubr.msk.bf16.vlgmr.msra.gmra.mxu1 %vm291_vm1, %v1418_v54 }
 0x728   :  { %1825 = vmatprep.mubr.bf16.mxu0 %v3826_v0  ;;  %1866 = vmatprep.mubr.bf16.mxu1 %v3826_v0 }
 0x729   :  { %1794 = vmatpush1.bf16.msra.mxu0 %v3484_v57  ;;  %1835 = vmatpush1.bf16.msra.mxu1 %v3487_v58 }
 0x72a   :  { %1795 = vmatprep.subr.bf16.mxu0 %v3492_v59  ;;  %1836 = vmatprep.subr.bf16.mxu1 %v3495_v60 }
 0x72d   :  { %1796 = vmatpush1.bf16.msra.mxu0 %v3490_v61  ;;  %1837 = vmatpush1.bf16.msra.mxu1 %v3493_v62 }
 0x72e   :  { %1797 = vmatprep.subr.bf16.mxu0 %v3498_v63  ;;  %1838 = vmatprep.subr.bf16.mxu1 %v3501_v1 }
 0x731   :  { %1798 = vmatpush1.bf16.msra.mxu0 %v3496_v2  ;;  %1839 = vmatpush1.bf16.msra.mxu1 %v3499_v3 }
 0x732   :  { %1799 = vmatprep.subr.bf16.mxu0 %v3504_v4  ;;  %1840 = vmatprep.subr.bf16.mxu1 %v3507_v5 }
 0x735   :  { %1800 = vmatpush1.bf16.msra.mxu0 %v3502_v6  ;;  %1841 = vmatpush1.bf16.msra.mxu1 %v3505_v15 }
 0x736   :  { %1801 = vmatprep.subr.bf16.mxu0 %v3510_v16  ;;  %1842 = vmatprep.subr.bf16.mxu1 %v3513_v19  ;;  %v4125_v16 = vld [vmem:[#allocation10 + $0x20] ss:$16 sps:$4 sm:$0xff]   ;;  %v4127_v19 = vld [vmem:[#allocation10 + $0x28] ss:$16 sps:$4 sm:$0xff]  }
 0x739   :  { %1802 = vmatpush1.bf16.msra.mxu0 %v3508_v22  ;;  %1843 = vmatpush1.bf16.msra.mxu1 %v3511_v23  ;;  %v4129_v23 = vld [vmem:[#allocation10 + $0x4] ss:$16 sps:$4 sm:$0xff]  }
 0x73a   :  { %1803 = vmatprep.subr.bf16.mxu0 %v3516_v24  ;;  %1844 = vmatprep.subr.bf16.mxu1 %v3519_v25  ;;  %v4131_v24 = vld [vmem:[#allocation10 + $0xc] ss:$16 sps:$4 sm:$0xff]   ;;  %v4137_v25 = vld [vmem:[#allocation10 + $0x8] ss:$16 sps:$4 sm:$0xff]  }
 0x73d   :  { %1804 = vmatpush1.bf16.msra.mxu0 %v3514_v26  ;;  %1845 = vmatpush1.bf16.msra.mxu1 %v3517_v27  ;;  %v1611_v26 = vld [vmem:[%s4334_s6] sm:$0xf] }
 0x73e   :  { %1805 = vmatprep.subr.bf16.mxu0 %v3522_v28  ;;  %1846 = vmatprep.subr.bf16.mxu1 %v3525_v9  ;;  %v1616_v27 = vrot.slane %v1611_v26, %v3968_v17  ;;  %v1620_v28 = vrot.slane %v1611_v26, %v3975_v20 }
 0x741   :  { %1806 = vmatpush1.bf16.msra.mxu0 %v3520_v8  ;;  %1847 = vmatpush1.bf16.msra.mxu1 %v3523_v12  ;;  %v1624_v8 = vrot.slane %v1611_v26, %v3970_v18  ;;  %v1628_v12 = vrot.slane %v1611_v26, %v3977_v21 }
 0x742   :  { %1807 = vmatprep.subr.bf16.mxu0 %v3528_v13  ;;  %1848 = vmatprep.subr.bf16.mxu1 %v3531_v29 }
 0x745   :  { %1808 = vmatpush1.bf16.msra.mxu0 %v3526_v30  ;;  %1849 = vmatpush1.bf16.msra.mxu1 %v3529_v31 }
 0x746   :  { %1940 = vmatprep.subr.bf16.mxu0 %v4111_v32  ;;  %1981 = vmatprep.subr.bf16.mxu1 %v4113_v10 }
 0x7e7   :  { %v1456_v33 = vpop.f32.mrf.mxu0  ;;  %v1497_v14 = vpop.f32.mrf.mxu1 }
 0x7e9   :  { %v1458_v34 = vpop.f32.mrf.mxu0  ;;  %v1499_v35 = vpop.f32.mrf.mxu1 }
 0x7ea   :  { %v1508_v36 = vcombine.low %v1456_v33, %v1458_v34  ;;  %v1509_v37 = vcombine.low %v1497_v14, %v1499_v35 }
 0x7eb   :  { %v1460_v38 = vpop.f32.mrf.mxu0  ;;  %v1501_v39 = vpop.f32.mrf.mxu1 }
 0x7ec   :  { %v1516_v40 = vrot.slane %v1508_v36, %v3983_v46  ;;  %v1523_v41 = vrot.slane %v1509_v37, %v3983_v46 }
 0x7ed   :  { %v1461_v42 = vpop.f32.mrf.mxu0  ;;  %v1502_v43 = vpop.f32.mrf.mxu1 }
 0x7ee   :  { %v1524_v44 = vcombine.low %v1516_v40, %v1523_v41 }
 0x7f0   :  { %v1531_v45 = vrot.slane %v1524_v44, %v3983_v46 }
 0x7f2   :  { %v1533_v48 = vadd.f32 %v1531_v45, %v1417_v47 }
 0x7f4   :  { %v1538_v49 = vrot.slane %v1533_v48, %v3968_v17  ;;  %v1542_v7 = vrot.slane %v1533_v48, %v3975_v20  ;;  %v1550_v52 = vrot.slane %v1533_v48, %v3977_v21  ;;  %v1546_v53 = vrot.slane %v1533_v48, %v3970_v18 }
 0x7f6   :  { %v1555_v51 = vmul.f32 0.5, %v1538_v49  ;;  %v1556_v11 = vmul.f32 0.5, %v1542_v7  ;;  %v1557_v54 = vmul.f32 0.5, %v1546_v53 }
 0x7f8   :  { %3622 = vtanh.f32 %v1555_v51 }
 0x7f9   :  { %3624 = vtanh.f32 %v1556_v11 }
 0x7fa   :  { %3626 = vtanh.f32 %v1550_v52 }
 0x7fb   :  { %3628 = vtanh.f32 %v1557_v54 }
 0x805   :  { %v3623_v55 = vpop.eup %3622 }
 0x806   :  { %v3625_v56 = vpop.eup %3624  ;;  %v1563_v57 = vmul.f32 0.5, %v3623_v55 }
 0x807   :  { %v1564_v58 = vmul.f32 0.5, %v3625_v56  ;;  %v3627_v60 = vpop.eup %3626 }
 0x808   :  { %v1567_v59 = vadd.f32 0.5, %v1563_v57  ;;  %v3629_v2 = vpop.eup %3628 }
 0x809   :  { %v1568_v61 = vadd.f32 0.5, %v1564_v58  ;;  %v1565_v3 = vmul.f32 0.5, %v3629_v2 }
 0x80a   :  { %v1572_v62 = vmul.f32 %v3627_v60, %v1567_v59 }
 0x80b   :  { %v1571_v63 = vmul.f32 %v1568_v61, %v4104_v50  ;;  %v1569_v4 = vadd.f32 0.5, %v1565_v3  ;;  %v4135_v50 = vld [vmem:[#allocation10] ss:$16 sps:$4 sm:$0xff]  }
 0x80d   :  { %v1573_v1 = vadd.f32 %v1572_v62, %v1571_v63 }
 0x80f   :  { %3630 = vtanh.f32 %v1573_v1 }
 0x81c   :  { %v3631_v5 = vpop.eup %3630 }
 0x81d   :  { %v1575_v6 = vmul.f32 %v3631_v5, %v1569_v4 }
 0x81f   :  { %1576 = vst [vmem:[#allocation2 + $0x7] sm:$0x1] %v1575_v6 }
 0x826   :  { %v1577_v15 = vld [vmem:[#allocation2] sm:$0xff] }
 0x827   :  { %v1578_v22 = vpack.c.bf16 %v1577_v15, %v1577_v15 }
 0x829   :  { %1826 = vmatmul.mubr.bf16.vlgmr.msra.gmra.mxu0 %v1578_v22  ;;  %1867 = vmatmul.mubr.bf16.vlgmr.msra.gmra.mxu1 %v1578_v22 }
 0x82a   :  { %1941 = vmatpush1.bf16.msra.mxu0 %v4125_v16  ;;  %1982 = vmatpush1.bf16.msra.mxu1 %v4127_v19 }
 0x82b   :  { %1942 = vmatprep.subr.bf16.mxu0 %v4129_v23  ;;  %1983 = vmatprep.subr.bf16.mxu1 %v4131_v24 }
 0x82c   :  { %1960 = vmatprep.mubr.bf16.mxu0 %v3826_v0  ;;  %2001 = vmatprep.mubr.bf16.mxu1 %v3826_v0 }
 0x82e   :  { %1943 = vmatpush1.bf16.msra.mxu0 %v4135_v50  ;;  %1984 = vmatpush1.bf16.msra.mxu1 %v4137_v25 }
 0x82f   :  { %2100 = vmatprep.subr.bf16.mxu0 %v4111_v32  ;;  %2141 = vmatprep.subr.bf16.mxu1 %v4113_v10 }
 0x831   :  { %1961 = vmatmul.mubr.bf16.vlgmr.msra.gmra.mxu0 %v3826_v0  ;;  %2002 = vmatmul.mubr.bf16.vlgmr.msra.gmra.mxu1 %v3826_v0 }
 0x832   :  { %2101 = vmatpush1.bf16.msra.mxu0 %v4125_v16  ;;  %2142 = vmatpush1.bf16.msra.mxu1 %v4127_v19 }
 0x833   :  { %2102 = vmatprep.subr.bf16.mxu0 %v4129_v23  ;;  %2143 = vmatprep.subr.bf16.mxu1 %v4131_v24 }
 0x834   :  { %2120 = vmatprep.mubr.bf16.mxu0 %v3826_v0  ;;  %2161 = vmatprep.mubr.bf16.mxu1 %v3826_v0 }
 0x836   :  { %2103 = vmatpush1.bf16.msra.mxu0 %v4135_v50  ;;  %2144 = vmatpush1.bf16.msra.mxu1 %v4137_v25 }
 0x837   :  { %2260 = vmatprep.subr.bf16.mxu0 %v4111_v32  ;;  %2301 = vmatprep.subr.bf16.mxu1 %v4113_v10 }
 0x8e9   :  { %v1827_v9 = vpop.f32.mrf.mxu0  ;;  %v1868_v13 = vpop.f32.mrf.mxu1 }
 0x8ea   :  { %v1828_v29 = vadd.f32 %v1827_v9, %v1616_v27  ;;  %v1869_v30 = vadd.f32 %v1868_v13, %v1624_v8 }
 0x8eb   :  { %v1829_v31 = vpop.f32.mrf.mxu0  ;;  %v1870_v33 = vpop.f32.mrf.mxu1 }
 0x8ec   :  { %1875 = vst [vmem:[#allocation3] sm:$0xff] %v1828_v29  ;;  %1877 = vst [vmem:[#allocation3 + $0x10] sm:$0xff] %v1869_v30  ;;  %v1830_v14 = vadd.f32 %v1829_v31, %v1620_v28  ;;  %v1871_v34 = vadd.f32 %v1870_v33, %v1628_v12 }
 0x8ed   :  { %v1831_v35 = vpop.f32.mrf.mxu0  ;;  %v1872_v36 = vpop.f32.mrf.mxu1 }
 0x8ee   :  { %1876 = vst [vmem:[#allocation3 + $0x8] sm:$0xff] %v1830_v14  ;;  %1878 = vst [vmem:[#allocation3 + $0x18] sm:$0xff] %v1871_v34 }
 0x8ef   :  { %v1832_v37 = vpop.f32.mrf.mxu0  ;;  %v1873_v38 = vpop.f32.mrf.mxu1 }
 0x8f1   :  { %v1962_v39 = vpop.f32.mrf.mxu0  ;;  %v2003_v40 = vpop.f32.mrf.mxu1 }
 0x8f3   :  { %v1964_v41 = vpop.f32.mrf.mxu0  ;;  %v2005_v42 = vpop.f32.mrf.mxu1 }
 0x8f4   :  { %v2014_v43 = vcombine.low %v1962_v39, %v1964_v41  ;;  %v2015_v44 = vcombine.low %v2003_v40, %v2005_v42 }
 0x8f5   :  { %v1966_v45 = vpop.f32.mrf.mxu0  ;;  %v2007_v47 = vpop.f32.mrf.mxu1  ;;  %v1887_v53 = vld [vmem:[#allocation3] ss:$8 sm:$0xf]  ;;  %v2083_v42 = vld [vmem:[#allocation3 + $0x1] ss:$8 sm:$0xf] }
 0x8f6   :  { %v2022_v48 = vrot.slane %v2014_v43, %v3983_v46  ;;  %v2029_v49 = vrot.slane %v2015_v44, %v3983_v46 }
 0x8f7   :  { %v1967_v7 = vpop.f32.mrf.mxu0  ;;  %v2008_v51 = vpop.f32.mrf.mxu1 }
 0x8f8   :  { %v2030_v11 = vcombine.low %v2022_v48, %v2029_v49 }
 0x8fa   :  { %v2037_v52 = vrot.slane %v2030_v11, %v3983_v46 }
 0x8fc   :  { %v2039_v54 = vadd.f32 %v2037_v52, %v1887_v53 }
 0x8fe   :  { %v2044_v55 = vrot.slane %v2039_v54, %v3968_v17  ;;  %v2048_v56 = vrot.slane %v2039_v54, %v3975_v20  ;;  %v2056_v59 = vrot.slane %v2039_v54, %v3977_v21  ;;  %v2052_v60 = vrot.slane %v2039_v54, %v3970_v18 }
 0x900   :  { %v2061_v57 = vmul.f32 0.5, %v2044_v55  ;;  %v2062_v58 = vmul.f32 0.5, %v2048_v56  ;;  %v2063_v61 = vmul.f32 0.5, %v2052_v60 }
 0x902   :  { %3632 = vtanh.f32 %v2061_v57 }
 0x903   :  { %3634 = vtanh.f32 %v2062_v58 }
 0x904   :  { %3636 = vtanh.f32 %v2056_v59 }
 0x905   :  { %3638 = vtanh.f32 %v2063_v61 }
 0x90f   :  { %v3633_v62 = vpop.eup %3632 }
 0x910   :  { %v3635_v63 = vpop.eup %3634  ;;  %v2069_v1 = vmul.f32 0.5, %v3633_v62 }
 0x911   :  { %v2070_v2 = vmul.f32 0.5, %v3635_v63  ;;  %v3637_v4 = vpop.eup %3636 }
 0x912   :  { %v2073_v3 = vadd.f32 0.5, %v2069_v1  ;;  %v3639_v26 = vpop.eup %3638 }
 0x913   :  { %v2074_v5 = vadd.f32 0.5, %v2070_v2  ;;  %v2071_v27 = vmul.f32 0.5, %v3639_v26 }
 0x914   :  { %v2078_v6 = vmul.f32 %v3637_v4, %v2073_v3 }
 0x915   :  { %v2077_v15 = vmul.f32 0.0, %v2074_v5  ;;  %v2075_v8 = vadd.f32 0.5, %v2071_v27 }
 0x917   :  { %v2079_v22 = vadd.f32 %v2078_v6, %v2077_v15 }
 0x919   :  { %3640 = vtanh.f32 %v2079_v22 }
 0x926   :  { %v3641_v28 = vpop.eup %3640 }
 0x927   :  { %v2081_v12 = vmul.f32 %v3641_v28, %v2075_v8 }
 0x929   :  { %2082 = vst [vmem:[#allocation2] sm:$0x1] %v2081_v12  ;;  %v2084_v9 = vpack.c.bf16 %v2081_v12, %v2081_v12 }
 0x92b   :  { %3403 = vmatmul.mubr.msk.bf16.vlgmr.msra.gmra.mxu0 %vm291_vm1, %v2084_v9  ;;  %3404 = vmatmul.mubr.msk.bf16.vlgmr.msra.gmra.mxu1 %vm291_vm1, %v2084_v9 }
 0x92c   :  { %2261 = vmatpush1.bf16.msra.mxu0 %v4125_v16  ;;  %2302 = vmatpush1.bf16.msra.mxu1 %v4127_v19 }
 0x92d   :  { %2262 = vmatprep.subr.bf16.mxu0 %v4129_v23  ;;  %2303 = vmatprep.subr.bf16.mxu1 %v4131_v24 }
 0x92e   :  { %2280 = vmatprep.mubr.bf16.mxu0 %v3826_v0  ;;  %2321 = vmatprep.mubr.bf16.mxu1 %v3826_v0 }
 0x930   :  { %2263 = vmatpush1.bf16.msra.mxu0 %v4135_v50  ;;  %2304 = vmatpush1.bf16.msra.mxu1 %v4137_v25 }
 0x931   :  { %2420 = vmatprep.subr.bf16.mxu0 %v4111_v32  ;;  %2461 = vmatprep.subr.bf16.mxu1 %v4113_v10 }
 0x9eb   :  { %v2122_v13 = vpop.f32.mrf.mxu0  ;;  %v2163_v29 = vpop.f32.mrf.mxu1 }
 0x9ed   :  { %v2124_v30 = vpop.f32.mrf.mxu0  ;;  %v2165_v31 = vpop.f32.mrf.mxu1 }
 0x9ee   :  { %v2174_v33 = vcombine.low %v2122_v13, %v2124_v30  ;;  %v2175_v14 = vcombine.low %v2163_v29, %v2165_v31  ;;  %v2243_v31 = vld [vmem:[#allocation3 + $0x2] ss:$8 sm:$0xf] }
 0x9ef   :  { %v2126_v34 = vpop.f32.mrf.mxu0  ;;  %v2167_v35 = vpop.f32.mrf.mxu1 }
 0x9f0   :  { %v2182_v36 = vrot.slane %v2174_v33, %v3983_v46  ;;  %v2189_v37 = vrot.slane %v2175_v14, %v3983_v46 }
 0x9f1   :  { %v2127_v38 = vpop.f32.mrf.mxu0  ;;  %v2168_v39 = vpop.f32.mrf.mxu1 }
 0x9f2   :  { %v2190_v40 = vcombine.low %v2182_v36, %v2189_v37 }
 0x9f4   :  { %v2197_v41 = vrot.slane %v2190_v40, %v3983_v46 }
 0x9f6   :  { %v2199_v43 = vadd.f32 %v2197_v41, %v2083_v42 }
 0x9f8   :  { %v2204_v44 = vrot.slane %v2199_v43, %v3968_v17  ;;  %v2208_v45 = vrot.slane %v2199_v43, %v3975_v20  ;;  %v2216_v49 = vrot.slane %v2199_v43, %v3977_v21  ;;  %v2212_v7 = vrot.slane %v2199_v43, %v3970_v18 }
 0x9fa   :  { %v2221_v47 = vmul.f32 0.5, %v2204_v44  ;;  %v2222_v48 = vmul.f32 0.5, %v2208_v45  ;;  %v2223_v51 = vmul.f32 0.5, %v2212_v7 }
 0x9fc   :  { %3642 = vtanh.f32 %v2221_v47 }
 0x9fd   :  { %3644 = vtanh.f32 %v2222_v48 }
 0x9fe   :  { %3646 = vtanh.f32 %v2216_v49 }
 0x9ff   :  { %3648 = vtanh.f32 %v2223_v51 }
 0xa09   :  { %v3643_v11 = vpop.eup %3642 }
 0xa0a   :  { %v3645_v52 = vpop.eup %3644  ;;  %v2229_v53 = vmul.f32 0.5, %v3643_v11 }
 0xa0b   :  { %v2230_v54 = vmul.f32 0.5, %v3645_v52  ;;  %v3647_v56 = vpop.eup %3646 }
 0xa0c   :  { %v2233_v55 = vadd.f32 0.5, %v2229_v53  ;;  %v3649_v61 = vpop.eup %3648 }
 0xa0d   :  { %v2234_v57 = vadd.f32 0.5, %v2230_v54  ;;  %v2231_v62 = vmul.f32 0.5, %v3649_v61 }
 0xa0e   :  { %v2238_v58 = vmul.f32 %v3647_v56, %v2233_v55 }
 0xa0f   :  { %v2237_v59 = vmul.f32 %v2234_v57, %v2079_v22  ;;  %v2235_v63 = vadd.f32 0.5, %v2231_v62 }
 0xa11   :  { %v2239_v60 = vadd.f32 %v2238_v58, %v2237_v59 }
 0xa13   :  { %3650 = vtanh.f32 %v2239_v60 }
 0xa20   :  { %v3651_v1 = vpop.eup %3650 }
 0xa21   :  { %v2241_v2 = vmul.f32 %v3651_v1, %v2235_v63 }
 0xa23   :  { %2242 = vst [vmem:[#allocation2 + $0x1] sm:$0x1] %v2241_v2  ;;  %v2244_v3 = vpack.c.bf16 %v2241_v2, %v2241_v2 }
 0xa25   :  { %3405 = vmatmul.mubr.msk.bf16.vlgmr.msra.gmra.mxu0 %vm291_vm1, %v2244_v3  ;;  %3406 = vmatmul.mubr.msk.bf16.vlgmr.msra.gmra.mxu1 %vm291_vm1, %v2244_v3 }
 0xa26   :  { %2421 = vmatpush1.bf16.msra.mxu0 %v4125_v16  ;;  %2462 = vmatpush1.bf16.msra.mxu1 %v4127_v19 }
 0xa27   :  { %2422 = vmatprep.subr.bf16.mxu0 %v4129_v23  ;;  %2463 = vmatprep.subr.bf16.mxu1 %v4131_v24 }
 0xa28   :  { %2440 = vmatprep.mubr.bf16.mxu0 %v3826_v0  ;;  %2481 = vmatprep.mubr.bf16.mxu1 %v3826_v0 }
 0xa2a   :  { %2423 = vmatpush1.bf16.msra.mxu0 %v4135_v50  ;;  %2464 = vmatpush1.bf16.msra.mxu1 %v4137_v25 }
 0xa2b   :  { %2580 = vmatprep.subr.bf16.mxu0 %v4111_v32  ;;  %2621 = vmatprep.subr.bf16.mxu1 %v4113_v10 }
 0xae5   :  { %v2282_v4 = vpop.f32.mrf.mxu0  ;;  %v2323_v5 = vpop.f32.mrf.mxu1 }
 0xae7   :  { %v2284_v6 = vpop.f32.mrf.mxu0  ;;  %v2325_v15 = vpop.f32.mrf.mxu1 }
 0xae8   :  { %v2334_v22 = vcombine.low %v2282_v4, %v2284_v6  ;;  %v2335_v26 = vcombine.low %v2323_v5, %v2325_v15  ;;  %v2403_v15 = vld [vmem:[#allocation3 + $0x3] ss:$8 sm:$0xf] }
 0xae9   :  { %v2286_v27 = vpop.f32.mrf.mxu0  ;;  %v2327_v8 = vpop.f32.mrf.mxu1 }
 0xaea   :  { %v2342_v28 = vrot.slane %v2334_v22, %v3983_v46  ;;  %v2349_v12 = vrot.slane %v2335_v26, %v3983_v46 }
 0xaeb   :  { %v2287_v9 = vpop.f32.mrf.mxu0  ;;  %v2328_v13 = vpop.f32.mrf.mxu1 }
 0xaec   :  { %v2350_v29 = vcombine.low %v2342_v28, %v2349_v12 }
 0xaee   :  { %v2357_v30 = vrot.slane %v2350_v29, %v3983_v46 }
 0xaf0   :  { %v2359_v33 = vadd.f32 %v2357_v30, %v2243_v31 }
 0xaf2   :  { %v2364_v14 = vrot.slane %v2359_v33, %v3968_v17  ;;  %v2368_v34 = vrot.slane %v2359_v33, %v3975_v20  ;;  %v2376_v37 = vrot.slane %v2359_v33, %v3977_v21  ;;  %v2372_v38 = vrot.slane %v2359_v33, %v3970_v18 }
 0xaf4   :  { %v2381_v35 = vmul.f32 0.5, %v2364_v14  ;;  %v2382_v36 = vmul.f32 0.5, %v2368_v34  ;;  %v2383_v39 = vmul.f32 0.5, %v2372_v38 }
 0xaf6   :  { %3652 = vtanh.f32 %v2381_v35 }
 0xaf7   :  { %3654 = vtanh.f32 %v2382_v36 }
 0xaf8   :  { %3656 = vtanh.f32 %v2376_v37 }
 0xaf9   :  { %3658 = vtanh.f32 %v2383_v39 }
 0xb03   :  { %v3653_v40 = vpop.eup %3652 }
 0xb04   :  { %v3655_v41 = vpop.eup %3654  ;;  %v2389_v42 = vmul.f32 0.5, %v3653_v40 }
 0xb05   :  { %v2390_v43 = vmul.f32 0.5, %v3655_v41  ;;  %v3657_v45 = vpop.eup %3656 }
 0xb06   :  { %v2393_v44 = vadd.f32 0.5, %v2389_v42  ;;  %v3659_v51 = vpop.eup %3658 }
 0xb07   :  { %v2394_v47 = vadd.f32 0.5, %v2390_v43  ;;  %v2391_v11 = vmul.f32 0.5, %v3659_v51 }
 0xb08   :  { %v2398_v48 = vmul.f32 %v3657_v45, %v2393_v44 }
 0xb09   :  { %v2397_v49 = vmul.f32 %v2394_v47, %v2239_v60  ;;  %v2395_v52 = vadd.f32 0.5, %v2391_v11 }
 0xb0b   :  { %v2399_v7 = vadd.f32 %v2398_v48, %v2397_v49 }
 0xb0d   :  { %3660 = vtanh.f32 %v2399_v7 }
 0xb1a   :  { %v3661_v53 = vpop.eup %3660 }
 0xb1b   :  { %v2401_v54 = vmul.f32 %v3661_v53, %v2395_v52 }
 0xb1d   :  { %2402 = vst [vmem:[#allocation2 + $0x2] sm:$0x1] %v2401_v54  ;;  %v2404_v55 = vpack.c.bf16 %v2401_v54, %v2401_v54 }
 0xb1f   :  { %3407 = vmatmul.mubr.msk.bf16.vlgmr.msra.gmra.mxu0 %vm291_vm1, %v2404_v55  ;;  %3408 = vmatmul.mubr.msk.bf16.vlgmr.msra.gmra.mxu1 %vm291_vm1, %v2404_v55 }
 0xb20   :  { %2581 = vmatpush1.bf16.msra.mxu0 %v4125_v16  ;;  %2622 = vmatpush1.bf16.msra.mxu1 %v4127_v19 }
 0xb21   :  { %2582 = vmatprep.subr.bf16.mxu0 %v4129_v23  ;;  %2623 = vmatprep.subr.bf16.mxu1 %v4131_v24 }
 0xb22   :  { %2600 = vmatprep.mubr.bf16.mxu0 %v3826_v0  ;;  %2641 = vmatprep.mubr.bf16.mxu1 %v3826_v0 }
 0xb24   :  { %2583 = vmatpush1.bf16.msra.mxu0 %v4135_v50  ;;  %2624 = vmatpush1.bf16.msra.mxu1 %v4137_v25 }
 0xb25   :  { %2740 = vmatprep.subr.bf16.mxu0 %v4111_v32  ;;  %2781 = vmatprep.subr.bf16.mxu1 %v4113_v10 }
 0xbdf   :  { %v2442_v56 = vpop.f32.mrf.mxu0  ;;  %v2483_v57 = vpop.f32.mrf.mxu1 }
 0xbe1   :  { %v2444_v58 = vpop.f32.mrf.mxu0  ;;  %v2485_v59 = vpop.f32.mrf.mxu1 }
 0xbe2   :  { %v2494_v60 = vcombine.low %v2442_v56, %v2444_v58  ;;  %v2495_v61 = vcombine.low %v2483_v57, %v2485_v59  ;;  %v2563_v59 = vld [vmem:[#allocation3 + $0x4] ss:$8 sm:$0xf] }
 0xbe3   :  { %v2446_v62 = vpop.f32.mrf.mxu0  ;;  %v2487_v63 = vpop.f32.mrf.mxu1 }
 0xbe4   :  { %v2502_v1 = vrot.slane %v2494_v60, %v3983_v46  ;;  %v2509_v2 = vrot.slane %v2495_v61, %v3983_v46 }
 0xbe5   :  { %v2447_v3 = vpop.f32.mrf.mxu0  ;;  %v2488_v4 = vpop.f32.mrf.mxu1 }
 0xbe6   :  { %v2510_v5 = vcombine.low %v2502_v1, %v2509_v2 }
 0xbe8   :  { %v2517_v6 = vrot.slane %v2510_v5, %v3983_v46 }
 0xbea   :  { %v2519_v22 = vadd.f32 %v2517_v6, %v2403_v15 }
 0xbec   :  { %v2524_v26 = vrot.slane %v2519_v22, %v3968_v17  ;;  %v2528_v27 = vrot.slane %v2519_v22, %v3975_v20  ;;  %v2536_v12 = vrot.slane %v2519_v22, %v3977_v21  ;;  %v2532_v9 = vrot.slane %v2519_v22, %v3970_v18 }
 0xbee   :  { %v2541_v8 = vmul.f32 0.5, %v2524_v26  ;;  %v2542_v28 = vmul.f32 0.5, %v2528_v27  ;;  %v2543_v13 = vmul.f32 0.5, %v2532_v9 }
 0xbf0   :  { %3662 = vtanh.f32 %v2541_v8 }
 0xbf1   :  { %3664 = vtanh.f32 %v2542_v28 }
 0xbf2   :  { %3666 = vtanh.f32 %v2536_v12 }
 0xbf3   :  { %3668 = vtanh.f32 %v2543_v13 }
 0xbfd   :  { %v3663_v29 = vpop.eup %3662 }
 0xbfe   :  { %v3665_v30 = vpop.eup %3664  ;;  %v2549_v31 = vmul.f32 0.5, %v3663_v29 }
 0xbff   :  { %v2550_v33 = vmul.f32 0.5, %v3665_v30  ;;  %v3667_v34 = vpop.eup %3666 }
 0xc00   :  { %v2553_v14 = vadd.f32 0.5, %v2549_v31  ;;  %v3669_v39 = vpop.eup %3668 }
 0xc01   :  { %v2554_v35 = vadd.f32 0.5, %v2550_v33  ;;  %v2551_v40 = vmul.f32 0.5, %v3669_v39 }
 0xc02   :  { %v2558_v36 = vmul.f32 %v3667_v34, %v2553_v14 }
 0xc03   :  { %v2557_v37 = vmul.f32 %v2554_v35, %v2399_v7  ;;  %v2555_v41 = vadd.f32 0.5, %v2551_v40 }
 0xc05   :  { %v2559_v38 = vadd.f32 %v2558_v36, %v2557_v37 }
 0xc07   :  { %3670 = vtanh.f32 %v2559_v38 }
 0xc14   :  { %v3671_v42 = vpop.eup %3670 }
 0xc15   :  { %v2561_v43 = vmul.f32 %v3671_v42, %v2555_v41 }
 0xc17   :  { %2562 = vst [vmem:[#allocation2 + $0x3] sm:$0x1] %v2561_v43  ;;  %v2564_v44 = vpack.c.bf16 %v2561_v43, %v2561_v43 }
 0xc19   :  { %3409 = vmatmul.mubr.msk.bf16.vlgmr.msra.gmra.mxu0 %vm291_vm1, %v2564_v44  ;;  %3410 = vmatmul.mubr.msk.bf16.vlgmr.msra.gmra.mxu1 %vm291_vm1, %v2564_v44 }
 0xc1a   :  { %2741 = vmatpush1.bf16.msra.mxu0 %v4125_v16  ;;  %2782 = vmatpush1.bf16.msra.mxu1 %v4127_v19 }
 0xc1b   :  { %2742 = vmatprep.subr.bf16.mxu0 %v4129_v23  ;;  %2783 = vmatprep.subr.bf16.mxu1 %v4131_v24 }
 0xc1c   :  { %2760 = vmatprep.mubr.bf16.mxu0 %v3826_v0  ;;  %2801 = vmatprep.mubr.bf16.mxu1 %v3826_v0 }
 0xc1e   :  { %2743 = vmatpush1.bf16.msra.mxu0 %v4135_v50  ;;  %2784 = vmatpush1.bf16.msra.mxu1 %v4137_v25 }
 0xc1f   :  { %2900 = vmatprep.subr.bf16.mxu0 %v4111_v32  ;;  %2941 = vmatprep.subr.bf16.mxu1 %v4113_v10 }
 0xcd9   :  { %v2602_v45 = vpop.f32.mrf.mxu0  ;;  %v2643_v47 = vpop.f32.mrf.mxu1 }
 0xcdb   :  { %v2604_v48 = vpop.f32.mrf.mxu0  ;;  %v2645_v49 = vpop.f32.mrf.mxu1 }
 0xcdc   :  { %v2654_v7 = vcombine.low %v2602_v45, %v2604_v48  ;;  %v2655_v51 = vcombine.low %v2643_v47, %v2645_v49 }
 0xcdd   :  { %v2606_v11 = vpop.f32.mrf.mxu0  ;;  %v2647_v52 = vpop.f32.mrf.mxu1 }
 0xcde   :  { %v2662_v53 = vrot.slane %v2654_v7, %v3983_v46  ;;  %v2669_v54 = vrot.slane %v2655_v51, %v3983_v46 }
 0xcdf   :  { %v2607_v55 = vpop.f32.mrf.mxu0  ;;  %v2648_v56 = vpop.f32.mrf.mxu1 }
 0xce0   :  { %v2670_v57 = vcombine.low %v2662_v53, %v2669_v54 }
 0xce2   :  { %v2677_v58 = vrot.slane %v2670_v57, %v3983_v46 }
 0xce4   :  { %v2679_v60 = vadd.f32 %v2677_v58, %v2563_v59 }
 0xce6   :  { %v2684_v61 = vrot.slane %v2679_v60, %v3968_v17  ;;  %v2688_v62 = vrot.slane %v2679_v60, %v3975_v20  ;;  %v2696_v2 = vrot.slane %v2679_v60, %v3977_v21  ;;  %v2692_v3 = vrot.slane %v2679_v60, %v3970_v18 }
 0xce8   :  { %v2701_v63 = vmul.f32 0.5, %v2684_v61  ;;  %v2702_v1 = vmul.f32 0.5, %v2688_v62  ;;  %v2703_v4 = vmul.f32 0.5, %v2692_v3 }
 0xcea   :  { %3672 = vtanh.f32 %v2701_v63 }
 0xceb   :  { %3674 = vtanh.f32 %v2702_v1 }
 0xcec   :  { %3676 = vtanh.f32 %v2696_v2 }
 0xced   :  { %3678 = vtanh.f32 %v2703_v4 }
 0xcf7   :  { %v3673_v5 = vpop.eup %3672 }
 0xcf8   :  { %v3675_v6 = vpop.eup %3674  ;;  %v2709_v15 = vmul.f32 0.5, %v3673_v5 }
 0xcf9   :  { %v2710_v22 = vmul.f32 0.5, %v3675_v6  ;;  %v3677_v27 = vpop.eup %3676 }
 0xcfa   :  { %v2713_v26 = vadd.f32 0.5, %v2709_v15  ;;  %v3679_v13 = vpop.eup %3678 }
 0xcfb   :  { %v2714_v8 = vadd.f32 0.5, %v2710_v22  ;;  %v2711_v29 = vmul.f32 0.5, %v3679_v13 }
 0xcfc   :  { %v2718_v28 = vmul.f32 %v3677_v27, %v2713_v26 }
 0xcfd   :  { %v2717_v12 = vmul.f32 %v2714_v8, %v2559_v38  ;;  %v2715_v30 = vadd.f32 0.5, %v2711_v29 }
 0xcff   :  { %v2719_v9 = vadd.f32 %v2718_v28, %v2717_v12 }
 0xd01   :  { %3680 = vtanh.f32 %v2719_v9 }
 0xd0e   :  { %v3681_v31 = vpop.eup %3680 }
 0xd0f   :  { %v2721_v33 = vmul.f32 %v3681_v31, %v2715_v30 }
 0xd11   :  { %2722 = vst [vmem:[#allocation2 + $0x4] sm:$0x1] %v2721_v33  ;;  %v2724_v14 = vpack.c.bf16 %v2721_v33, %v2721_v33 }
 0xd13   :  { %3411 = vmatmul.mubr.msk.bf16.vlgmr.msra.gmra.mxu0 %vm291_vm1, %v2724_v14  ;;  %3412 = vmatmul.mubr.msk.bf16.vlgmr.msra.gmra.mxu1 %vm291_vm1, %v2724_v14 }
 0xd14   :  { %2901 = vmatpush1.bf16.msra.mxu0 %v4125_v16  ;;  %2942 = vmatpush1.bf16.msra.mxu1 %v4127_v19 }
 0xd15   :  { %2902 = vmatprep.subr.bf16.mxu0 %v4129_v23  ;;  %2943 = vmatprep.subr.bf16.mxu1 %v4131_v24 }
 0xd16   :  { %2920 = vmatprep.mubr.bf16.mxu0 %v3826_v0  ;;  %2961 = vmatprep.mubr.bf16.mxu1 %v3826_v0 }
 0xd18   :  { %2903 = vmatpush1.bf16.msra.mxu0 %v4135_v50  ;;  %2944 = vmatpush1.bf16.msra.mxu1 %v4137_v25 }
 0xd19   :  { %3060 = vmatprep.subr.bf16.mxu0 %v4111_v32  ;;  %3101 = vmatprep.subr.bf16.mxu1 %v4113_v10  ;;  %v2723_v32 = vld [vmem:[#allocation3 + $0x5] ss:$8 sm:$0xf] }
 0xdd3   :  { %v2762_v34 = vpop.f32.mrf.mxu0  ;;  %v2803_v35 = vpop.f32.mrf.mxu1 }
 0xdd5   :  { %v2764_v36 = vpop.f32.mrf.mxu0  ;;  %v2805_v37 = vpop.f32.mrf.mxu1 }
 0xdd6   :  { %v2814_v38 = vcombine.low %v2762_v34, %v2764_v36  ;;  %v2815_v39 = vcombine.low %v2803_v35, %v2805_v37 }
 0xdd7   :  { %v2766_v40 = vpop.f32.mrf.mxu0  ;;  %v2807_v41 = vpop.f32.mrf.mxu1 }
 0xdd8   :  { %v2822_v42 = vrot.slane %v2814_v38, %v3983_v46  ;;  %v2829_v43 = vrot.slane %v2815_v39, %v3983_v46 }
 0xdd9   :  { %v2767_v44 = vpop.f32.mrf.mxu0  ;;  %v2808_v45 = vpop.f32.mrf.mxu1 }
 0xdda   :  { %v2830_v47 = vcombine.low %v2822_v42, %v2829_v43 }
 0xddc   :  { %v2837_v48 = vrot.slane %v2830_v47, %v3983_v46 }
 0xdde   :  { %v2839_v49 = vadd.f32 %v2837_v48, %v2723_v32 }
 0xde0   :  { %v2844_v10 = vrot.slane %v2839_v49, %v3968_v17  ;;  %v2848_v7 = vrot.slane %v2839_v49, %v3975_v20  ;;  %v2856_v52 = vrot.slane %v2839_v49, %v3977_v21  ;;  %v2852_v53 = vrot.slane %v2839_v49, %v3970_v18 }
 0xde2   :  { %v2861_v51 = vmul.f32 0.5, %v2844_v10  ;;  %v2862_v11 = vmul.f32 0.5, %v2848_v7  ;;  %v2863_v54 = vmul.f32 0.5, %v2852_v53  ;;  %v3545_v53 = vld [vmem:[%s4335_s7 + $0x30] sm:$0xff]  }
 0xde4   :  { %3682 = vtanh.f32 %v2861_v51 }
 0xde5   :  { %3684 = vtanh.f32 %v2862_v11  ;;  %v3544_v11 = vld [vmem:[%s4335_s7 + $0x38] sm:$0xff]  }
 0xde6   :  { %3686 = vtanh.f32 %v2856_v52  ;;  %v3828_v52 = vmov 0.0  }
 0xde7   :  { %3688 = vtanh.f32 %v2863_v54  ;;  %v3546_v54 = vld [vmem:[%s4335_s7 + $0x28] sm:$0xff]  }
 0xdf1   :  { %v3683_v55 = vpop.eup %3682 }
 0xdf2   :  { %v3685_v56 = vpop.eup %3684  ;;  %v2869_v57 = vmul.f32 0.5, %v3683_v55  ;;  %v3547_v55 = vld [vmem:[%s4335_s7 + $0x20] sm:$0xff]  }
 0xdf3   :  { %v2870_v58 = vmul.f32 0.5, %v3685_v56  ;;  %v3687_v60 = vpop.eup %3686  ;;  %v3548_v56 = vld [vmem:[%s4335_s7 + $0x18] sm:$0xff]  }
 0xdf4   :  { %v2873_v59 = vadd.f32 0.5, %v2869_v57  ;;  %v3689_v2 = vpop.eup %3688  ;;  %v3549_v57 = vld [vmem:[%s4335_s7 + $0x10] sm:$0xff]  }
 0xdf5   :  { %v2874_v61 = vadd.f32 0.5, %v2870_v58  ;;  %v2871_v3 = vmul.f32 0.5, %v3689_v2  ;;  %v3550_v58 = vld [vmem:[%s4335_s7 + $0x8] sm:$0xff]  }
 0xdf6   :  { %v2878_v62 = vmul.f32 %v3687_v60, %v2873_v59  ;;  %v3551_v59 = vld [vmem:[%s4335_s7] sm:$0xff]  }
 0xdf7   :  { %v2877_v63 = vmul.f32 %v2874_v61, %v2719_v9  ;;  %v2875_v4 = vadd.f32 0.5, %v2871_v3 }
 0xdf9   :  { %v2879_v1 = vadd.f32 %v2878_v62, %v2877_v63 }
 0xdfb   :  { %3690 = vtanh.f32 %v2879_v1 }
 0xe08   :  { %v3691_v5 = vpop.eup %3690 }
 0xe09   :  { %v2881_v6 = vmul.f32 %v3691_v5, %v2875_v4 }
 0xe0b   :  { %2882 = vst [vmem:[#allocation2 + $0x5] sm:$0x1] %v2881_v6  ;;  %v2884_v15 = vpack.c.bf16 %v2881_v6, %v2881_v6 }
 0xe0d   :  { %3413 = vmatmul.mubr.msk.bf16.vlgmr.msra.gmra.mxu0 %vm291_vm1, %v2884_v15  ;;  %3414 = vmatmul.mubr.msk.bf16.vlgmr.msra.gmra.mxu1 %vm291_vm1, %v2884_v15 }
 0xe0e   :  { %3061 = vmatpush1.bf16.msra.mxu0 %v4125_v16  ;;  %3102 = vmatpush1.bf16.msra.mxu1 %v4127_v19 }
 0xe0f   :  { %3062 = vmatprep.subr.bf16.mxu0 %v4129_v23  ;;  %3103 = vmatprep.subr.bf16.mxu1 %v4131_v24 }
 0xe10   :  { %3080 = vmatprep.mubr.bf16.mxu0 %v3826_v0  ;;  %3121 = vmatprep.mubr.bf16.mxu1 %v3826_v0 }
 0xe12   :  { %3063 = vmatpush1.bf16.msra.mxu0 %v4135_v50  ;;  %3104 = vmatpush1.bf16.msra.mxu1 %v4137_v25  ;;  %v2883_v50 = vld [vmem:[#allocation3 + $0x6] ss:$8 sm:$0xf] }
 0xe13   :  { %3435 = vmatprep.subr.bf16.mxu0 %v3828_v52 }
 0xecd   :  { %v2922_v22 = vpop.f32.mrf.mxu0  ;;  %v2963_v26 = vpop.f32.mrf.mxu1 }
 0xecf   :  { %v2924_v27 = vpop.f32.mrf.mxu0  ;;  %v2965_v8 = vpop.f32.mrf.mxu1 }
 0xed0   :  { %v2974_v28 = vcombine.low %v2922_v22, %v2924_v27  ;;  %v2975_v16 = vcombine.low %v2963_v26, %v2965_v8  ;;  %v3043_v8 = vld [vmem:[#allocation3 + $0x7] ss:$8 sm:$0xf] }
 0xed1   :  { %v2926_v12 = vpop.f32.mrf.mxu0  ;;  %v2967_v19 = vpop.f32.mrf.mxu1 }
 0xed2   :  { %v2982_v23 = vrot.slane %v2974_v28, %v3983_v46  ;;  %v2989_v24 = vrot.slane %v2975_v16, %v3983_v46 }
 0xed3   :  { %v2927_v9 = vpop.f32.mrf.mxu0  ;;  %v2968_v13 = vpop.f32.mrf.mxu1 }
 0xed4   :  { %v2990_v29 = vcombine.low %v2982_v23, %v2989_v24 }
 0xed6   :  { %v2997_v0 = vrot.slane %v2990_v29, %v3983_v46 }
 0xed8   :  { %v2999_v30 = vadd.f32 %v2997_v0, %v2883_v50 }
 0xeda   :  { %v3004_v25 = vrot.slane %v2999_v30, %v3968_v17  ;;  %v3008_v31 = vrot.slane %v2999_v30, %v3975_v20  ;;  %v3016_v34 = vrot.slane %v2999_v30, %v3977_v21  ;;  %v3012_v35 = vrot.slane %v2999_v30, %v3970_v18 }
 0xedc   :  { %v3021_v33 = vmul.f32 0.5, %v3004_v25  ;;  %v3022_v14 = vmul.f32 0.5, %v3008_v31  ;;  %v3023_v36 = vmul.f32 0.5, %v3012_v35 }
 0xede   :  { %3692 = vtanh.f32 %v3021_v33 }
 0xedf   :  { %3694 = vtanh.f32 %v3022_v14 }
 0xee0   :  { %3696 = vtanh.f32 %v3016_v34 }
 0xee1   :  { %3698 = vtanh.f32 %v3023_v36 }
 0xeeb   :  { %v3693_v37 = vpop.eup %3692 }
 0xeec   :  { %v3695_v38 = vpop.eup %3694  ;;  %v3029_v39 = vmul.f32 0.5, %v3693_v37 }
 0xeed   :  { %v3030_v40 = vmul.f32 0.5, %v3695_v38  ;;  %v3697_v42 = vpop.eup %3696  ;;  %v3417_v38 = vld [vmem:[%s4336_s8] ss:$0 sm:$0xff] }
 0xeee   :  { %v3033_v41 = vadd.f32 0.5, %v3029_v39  ;;  %v3699_v48 = vpop.eup %3698 }
 0xeef   :  { %v3034_v43 = vadd.f32 0.5, %v3030_v40  ;;  %v3031_v32 = vmul.f32 0.5, %v3699_v48 }
 0xef0   :  { %v3038_v44 = vmul.f32 %v3697_v42, %v3033_v41 }
 0xef1   :  { %v3037_v45 = vmul.f32 %v3034_v43, %v2879_v1  ;;  %v3035_v49 = vadd.f32 0.5, %v3031_v32 }
 0xef3   :  { %v4285_v47 = vadd.f32 %v3038_v44, %v3037_v45 }
 0xef5   :  { %3700 = vtanh.f32 %v4285_v47 }
 0xf02   :  { %v3701_v10 = vpop.eup %3700 }
 0xf03   :  { %v3041_v7 = vmul.f32 %v3701_v10, %v3035_v49 }
 0xf05   :  { %3042 = vst [vmem:[#allocation2 + $0x6] sm:$0x1] %v3041_v7  ;;  %v3044_v51 = vpack.c.bf16 %v3041_v7, %v3041_v7 }
 0xf07   :  { %3415 = vmatmul.mubr.msk.bf16.vlgmr.msra.gmra.mxu0 %vm291_vm1, %v3044_v51  ;;  %3416 = vmatmul.mubr.msk.bf16.vlgmr.msra.gmra.mxu1 %vm291_vm1, %v3044_v51 }
 0xf08   :  { %3436 = vmatpush3.bf16.msra.mxu0 %v3544_v11  ;;  %3451 = vmatprep.mubr.msk.bf16.mxu0 %vm3829_vm2, %v3828_v52 }
 0xf09   :  { %3437 = vmatprep.subr.bf16.mxu0 %v3828_v52 }
 0xf0c   :  { %3438 = vmatpush3.bf16.msra.mxu0 %v3545_v53 }
 0xf0d   :  { %3439 = vmatprep.subr.bf16.mxu0 %v3828_v52 }
 0xf10   :  { %3440 = vmatpush3.bf16.msra.mxu0 %v3546_v54 }
 0xf11   :  { %3441 = vmatprep.subr.bf16.mxu0 %v3828_v52 }
 0xf14   :  { %3442 = vmatpush3.bf16.msra.mxu0 %v3547_v55 }
 0xf15   :  { %3443 = vmatprep.subr.bf16.mxu0 %v3828_v52 }
 0xf18   :  { %3444 = vmatpush3.bf16.msra.mxu0 %v3548_v56 }
 0xf19   :  { %3445 = vmatprep.subr.bf16.mxu0 %v3828_v52 }
 0xf1c   :  { %3446 = vmatpush3.bf16.msra.mxu0 %v3549_v57 }
 0xf1d   :  { %3447 = vmatprep.subr.bf16.mxu0 %v3828_v52 }
 0xf20   :  { %3448 = vmatpush3.bf16.msra.mxu0 %v3550_v58 }
 0xf21   :  { %3449 = vmatprep.subr.bf16.mxu0 %v3828_v52 }
 0xf24   :  { %3450 = vmatpush3.bf16.msra.mxu0 %v3551_v59 }
 0xfc7   :  { %v3082_v60 = vpop.f32.mrf.mxu0  ;;  %v3123_v61 = vpop.f32.mrf.mxu1 }
 0xfc9   :  { %v3084_v62 = vpop.f32.mrf.mxu0  ;;  %v3125_v63 = vpop.f32.mrf.mxu1 }
 0xfca   :  { %v3134_v1 = vcombine.low %v3082_v60, %v3084_v62  ;;  %v3135_v2 = vcombine.low %v3123_v61, %v3125_v63 }
 0xfcb   :  { %v3086_v3 = vpop.f32.mrf.mxu0  ;;  %v3127_v4 = vpop.f32.mrf.mxu1 }
 0xfcc   :  { %v3142_v5 = vrot.slane %v3134_v1, %v3983_v46  ;;  %v3149_v6 = vrot.slane %v3135_v2, %v3983_v46 }
 0xfcd   :  { %v3087_v15 = vpop.f32.mrf.mxu0  ;;  %v3128_v22 = vpop.f32.mrf.mxu1 }
 0xfce   :  { %v3150_v26 = vcombine.low %v3142_v5, %v3149_v6 }
 0xfd0   :  { %v3157_v27 = vrot.slane %v3150_v26, %v3983_v46 }
 0xfd2   :  { %v3159_v28 = vadd.f32 %v3157_v27, %v3043_v8 }
 0xfd4   :  { %v3164_v16 = vrot.slane %v3159_v28, %v3968_v17  ;;  %v3168_v12 = vrot.slane %v3159_v28, %v3975_v20  ;;  %v3176_v24 = vrot.slane %v3159_v28, %v3977_v21  ;;  %v3172_v9 = vrot.slane %v3159_v28, %v3970_v18 }
 0xfd6   :  { %v3181_v19 = vmul.f32 0.5, %v3164_v16  ;;  %v3182_v23 = vmul.f32 0.5, %v3168_v12  ;;  %v3183_v13 = vmul.f32 0.5, %v3172_v9 }
 0xfd8   :  { %3702 = vtanh.f32 %v3181_v19 }
 0xfd9   :  { %3704 = vtanh.f32 %v3182_v23 }
 0xfda   :  { %3706 = vtanh.f32 %v3176_v24 }
 0xfdb   :  { %3708 = vtanh.f32 %v3183_v13 }
 0xfe5   :  { %v3703_v29 = vpop.eup %3702 }
 0xfe6   :  { %v3705_v0 = vpop.eup %3704  ;;  %v3189_v50 = vmul.f32 0.5, %v3703_v29 }
 0xfe7   :  { %v3190_v46 = vmul.f32 0.5, %v3705_v0  ;;  %v3707_v25 = vpop.eup %3706 }
 0xfe8   :  { %v3193_v30 = vadd.f32 0.5, %v3189_v50  ;;  %v3709_v21 = vpop.eup %3708 }
 0xfe9   :  { %v3194_v17 = vadd.f32 0.5, %v3190_v46  ;;  %v3191_v14 = vmul.f32 0.5, %v3709_v21 }
 0xfea   :  { %v3198_v31 = vmul.f32 %v3707_v25, %v3193_v30 }
 0xfeb   :  { %v3197_v20 = vmul.f32 %v3194_v17, %v4285_v47  ;;  %v3195_v34 = vadd.f32 0.5, %v3191_v14 }
 0xfed   :  { %v3199_v33 = vadd.f32 %v3198_v31, %v3197_v20 }
 0xfef   :  { %3710 = vtanh.f32 %v3199_v33 }
 0xffc   :  { %v3711_v35 = vpop.eup %3710 }
 0xffd   :  { %v3201_v36 = vmul.f32 %v3711_v35, %v3195_v34 }
 0xfff   :  { %3202 = vst [vmem:[#allocation2 + $0x7] sm:$0x1] %v3201_v36 }
0x1006   :  { %v3203_v18 = vld [vmem:[#allocation2] sm:$0xff] }
0x1007   :  { %v3204_v37 = vpack.c.bf16 %v3203_v18, %v3203_v18 }
0x1009   :  { %3452 = vmatmul.mubr.bf16.vlgmr.msra.gmra.mxu0 %v3204_v37 }
0x10c9   :  { %v3310_v39 = vpop.f32.mrf.mxu0 }
0x10ca   :  { %v3311_v40 = vadd.f32 %v3417_v38, %v3310_v39 }
0x10cb   :  { %v3453_v41 = vpop.f32.mrf.mxu0 }
0x10cc   :  { %3317 = vst.msk [vmem:[#allocation12] sm:$0xff] %vm3316_vm3, %v3311_v40 }
0x10cd   :  { %v3313_v42 = vpop.f32.mrf.mxu0 }
0x10ce   :  { %3803 = shalt.err (!%p3800_p10)
}
0x10cf   :  { %3327 = dma.vmem_to_hbm [thread:$0]  %s3325_s16, 128, %s4337_s9, [#allocation6]   ;;  %v3454_v43 = vpop.f32.mrf.mxu0 }
0x10d0   :  { %3818 = dma.done.wait [#allocation6], 128  }
0x10d1   :  { %3819 = vsyncadd [#allocation6], 4294967168 }
0x10d2   :  { %3331 = vsyncpa [#allocation5], 1 }
0x10d3   :  { %3332 = vsyncpa [#allocation8], 1 }
0x10d4   :  { %3333 = vsyncpa [#allocation11], 1 }
0x10d5   :  { %3334 = vsyncpa [#allocation6], 1 }

</bundles_post_ra>
